<compile_context>
chip_gen: v5e
topology: v5e:2x2
jax: 0.10.0
libtpu: 0.0.40
codegen_flags: <defaults>
</compile_context>

<pallas_src>
import functools

import jax
import jax.numpy as jnp
from jax import lax
from jax.experimental import pallas as pl
from jax.experimental.pallas import tpu as pltpu

NEG_INF = -1e9  # Python float -> jaxpr literal (NOT a captured jax.Array constant)


# ---------------------------------------------------------------------------
# In-kernel building blocks (operate on values already loaded into vregs)
# ---------------------------------------------------------------------------
def _add_layernorm(a, b, gamma, beta, eps):
    """LayerNorm(a + b) over the last axis, f32 statistics, rsqrt on the EUP."""
    x = a + b
    mu = jnp.mean(x, axis=-1, keepdims=True)
    xc = x - mu
    var = jnp.mean(xc * xc, axis=-1, keepdims=True)
    return xc * lax.rsqrt(var + eps) * gamma + beta


def _mha(xq, xkv, bias, wq, bq, wk, bk, wv, bv, wo, bo, num_heads):
    """Multi-head attention: bf16 MXU matmuls, f32 accumulation, f32 softmax.

    bias is an additive float mask broadcastable to [Sq, Sk].  Per-head output
    projection is accumulated into a single [Sq, E] f32 accumulator.
    """
    cdt = wq.dtype  # bf16 compute dtype for the MXU
    q = jnp.dot(xq.astype(cdt), wq, preferred_element_type=jnp.float32) + bq
    k = jnp.dot(xkv.astype(cdt), wk, preferred_element_type=jnp.float32) + bk
    v = jnp.dot(xkv.astype(cdt), wv, preferred_element_type=jnp.float32) + bv

    e = q.shape[-1]
    dh = e // num_heads
    scale = 1.0 / float(dh) ** 0.5  # Python float -> literal

    acc = jnp.zeros((xq.shape[0], e), jnp.float32)
    for h in range(num_heads):  # static unroll over heads
        lo = h * dh
        qh = q[:, lo:lo + dh].astype(cdt)
        kh = k[:, lo:lo + dh].astype(cdt)
        vh = v[:, lo:lo + dh].astype(cdt)
        # scores: contract the head dim of q against the head dim of k (no .T)
        s = lax.dot_general(qh, kh, (((1,), (1,)), ((), ())),
                            preferred_element_type=jnp.float32)
        s = s * scale + bias
        s = s - jnp.max(s, axis=-1, keepdims=True)
        p = jnp.exp(s)
        p = p * pl.reciprocal(jnp.sum(p, axis=-1, keepdims=True), approx=True)
        ctx = jnp.dot(p.astype(cdt), vh, preferred_element_type=jnp.float32)   # [Sq, Dh]
        # fuse output projection: accumulate ctx_h @ Wo[lo:hi, :]
        acc = acc + jnp.dot(ctx.astype(cdt), wo[lo:lo + dh, :],
                            preferred_element_type=jnp.float32)
    return acc + bo


# ---------------------------------------------------------------------------
# Fused decoder-layer kernel (one grid step == one batch element)
# ---------------------------------------------------------------------------
def _decoder_layer_kernel(*refs, num_heads, eps, cross_attend):
    if cross_attend:
        (x_ref, enc_ref, mask_ref, dpad_ref, epad_ref,
         wq1, bq1, wk1, bk1, wv1, bv1, wo1, bo1, g1, be1,
         wq2, bq2, wk2, bk2, wv2, bv2, wo2, bo2, g2, be2,
         wf1, bf1, wf2, bf2, g3, be3,
         out_ref) = refs
    else:
        (x_ref, mask_ref, dpad_ref,
         wq1, bq1, wk1, bk1, wv1, bv1, wo1, bo1, g1, be1,
         wf1, bf1, wf2, bf2, g3, be3,
         out_ref) = refs

    x = x_ref[0]  # [Sq, E] f32

    # --- self-attention block: additive bias built in-kernel (attn_mask + key padding) ---
    self_bias = mask_ref[...] + jnp.where(dpad_ref[0] != 0, NEG_INF, 0.0)
    attn1 = _mha(x, x, self_bias,
                 wq1[...], bq1[...], wk1[...], bk1[...],
                 wv1[...], bv1[...], wo1[...], bo1[...], num_heads)
    out1 = _add_layernorm(attn1, x, g1[...], be1[...], eps)

    # --- cross-attention block ---
    if cross_attend:
        enc = enc_ref[0]  # [S_enc, E] f32
        cross_bias = jnp.where(epad_ref[0] != 0, NEG_INF, 0.0)  # [1, S_enc]
        attn2 = _mha(out1, enc, cross_bias,
                     wq2[...], bq2[...], wk2[...], bk2[...],
                     wv2[...], bv2[...], wo2[...], bo2[...], num_heads)
        out2 = _add_layernorm(attn2, out1, g2[...], be2[...], eps)
    else:
        out2 = out1

    # --- feed-forward block (ReLU MLP), fused residual + LayerNorm epilogue ---
    w1 = wf1[...]
    w2 = wf2[...]
    cdt = w1.dtype
    h = jnp.dot(out2.astype(cdt), w1, preferred_element_type=jnp.float32) + bf1[...]
    h = jnp.maximum(h, 0.0)
    ffn = jnp.dot(h.astype(cdt), w2, preferred_element_type=jnp.float32) + bf2[...]
    out_ref[0] = _add_layernorm(ffn, out2, g3[...], be3[...], eps)


# ---------------------------------------------------------------------------
# pallas_call wrapper + parameters
# ---------------------------------------------------------------------------
def _full(shape):
    nd = len(shape)
    return pl.BlockSpec(shape, lambda b, _nd=nd: (0,) * _nd)


def decoder_layer_forward(params, x, enc_output, dec_attention_mask,
                          dec_padding_mask, enc_padding_mask, *,
                          num_heads, cross_attend=True, layernorm_eps=1e-6):
    """Matches DecoderLayer.forward in eval mode (dropouts are identity)."""
    B, Sq, E = x.shape
    assert E % num_heads == 0, "embedding_dim must be divisible by num_heads"
    S_enc = enc_output.shape[1]
    F = params["w_ff1"].shape[1]

    x = x.astype(jnp.float32)
    enc_output = enc_output.astype(jnp.float32)
    attn_mask = dec_attention_mask.astype(jnp.float32)               # [Sq, Sq] additive
    dec_pad = dec_padding_mask.astype(jnp.int32).reshape(B, 1, Sq)   # True/1 = ignore key
    enc_pad = enc_padding_mask.astype(jnp.int32).reshape(B, 1, S_enc)

    def per_batch(s, d):
        return pl.BlockSpec((1, s, d), lambda b: (b, 0, 0))

    mha1 = [params[k] for k in ("wq1", "bq1", "wk1", "bk1", "wv1", "bv1", "wo1", "bo1")]
    ln1 = [params["g1"], params["beta1"]]
    ffn = [params["w_ff1"], params["b_ff1"], params["w_ff2"], params["b_ff2"]]
    ln3 = [params["g3"], params["beta3"]]

    mha_specs = [_full((E, E)), _full((1, E))] * 4
    ln_specs = [_full((1, E)), _full((1, E))]
    ffn_specs = [_full((E, F)), _full((1, F)), _full((F, E)), _full((1, E))]

    if cross_attend:
        mha2 = [params[k] for k in ("wq2", "bq2", "wk2", "bk2", "wv2", "bv2", "wo2", "bo2")]
        ln2 = [params["g2"], params["beta2"]]
        args = ([x, enc_output, attn_mask, dec_pad, enc_pad]
                + mha1 + ln1 + mha2 + ln2 + ffn + ln3)
        in_specs = ([per_batch(Sq, E), per_batch(S_enc, E), _full((Sq, Sq)),
                     per_batch(1, Sq), per_batch(1, S_enc)]
                    + mha_specs + ln_specs + mha_specs + ln_specs + ffn_specs + ln_specs)
    else:
        args = [x, attn_mask, dec_pad] + mha1 + ln1 + ffn + ln3
        in_specs = ([per_batch(Sq, E), _full((Sq, Sq)), per_batch(1, Sq)]
                    + mha_specs + ln_specs + ffn_specs + ln_specs)

    kernel = functools.partial(_decoder_layer_kernel, num_heads=num_heads,
                               eps=float(layernorm_eps), cross_attend=cross_attend)

    return pl.pallas_call(
        kernel,
        out_shape=jax.ShapeDtypeStruct((B, Sq, E), jnp.float32),
        grid=(B,),
        in_specs=in_specs,
        out_specs=per_batch(Sq, E),
        compiler_params=pltpu.CompilerParams(dimension_semantics=("parallel",)),
    )(*args)


def init_decoder_layer_params(key, embedding_dim, fully_connected_dim, cross_attend=True):
    E, F = embedding_dim, fully_connected_dim

    def w(k, shape, scale=0.05):
        # matmul weights stored bf16 (MXU compute dtype); stored as [in, out] so kernels do x @ W
        return (scale * jax.random.normal(k, shape, dtype=jnp.float32)).astype(jnp.bfloat16)

    keys = jax.random.split(key, 12)
    p = {
        # self-attention (mha1)
        "wq1": w(keys[0], (E, E)), "bq1": jnp.zeros((1, E), jnp.float32),
        "wk1": w(keys[1], (E, E)), "bk1": jnp.zeros((1, E), jnp.float32),
        "wv1": w(keys[2], (E, E)), "bv1": jnp.zeros((1, E), jnp.float32),
        "wo1": w(keys[3], (E, E)), "bo1": jnp.zeros((1, E), jnp.float32),
        # layernorms (f32)
        "g1": jnp.ones((1, E), jnp.float32), "beta1": jnp.zeros((1, E), jnp.float32),
        "g3": jnp.ones((1, E), jnp.float32), "beta3": jnp.zeros((1, E), jnp.float32),
        # ffn
        "w_ff1": w(keys[4], (E, F)), "b_ff1": jnp.zeros((1, F), jnp.float32),
        "w_ff2": w(keys[5], (F, E)), "b_ff2": jnp.zeros((1, E), jnp.float32),
    }
    if cross_attend:
        p.update({
            "wq2": w(keys[6], (E, E)), "bq2": jnp.zeros((1, E), jnp.float32),
            "wk2": w(keys[7], (E, E)), "bk2": jnp.zeros((1, E), jnp.float32),
            "wv2": w(keys[8], (E, E)), "bv2": jnp.zeros((1, E), jnp.float32),
            "wo2": w(keys[9], (E, E)), "bo2": jnp.zeros((1, E), jnp.float32),
            "g2": jnp.ones((1, E), jnp.float32), "beta2": jnp.zeros((1, E), jnp.float32),
        })
    return p


# ---------------------------------------------------------------------------
# Pure-JAX reference (same math / dtype strategy) for correctness checking
# ---------------------------------------------------------------------------
def decoder_layer_reference(params, x, enc_output, attn_mask, dec_pad, enc_pad, *,
                            num_heads, cross_attend=True, eps=1e-6):
    def mha_one(xq, xkv, bias, wq, bq, wk, bk, wv, bv, wo, bo):
        cdt = wq.dtype
        q = jnp.dot(xq.astype(cdt), wq, preferred_element_type=jnp.float32) + bq
        k = jnp.dot(xkv.astype(cdt), wk, preferred_element_type=jnp.float32) + bk
        v = jnp.dot(xkv.astype(cdt), wv, preferred_element_type=jnp.float32) + bv
        e = q.shape[-1]
        dh = e // num_heads
        scale = 1.0 / float(dh) ** 0.5
        acc = jnp.zeros((xq.shape[0], e), jnp.float32)
        for h in range(num_heads):
            lo = h * dh
            qh, kh, vh = (t[:, lo:lo + dh].astype(cdt) for t in (q, k, v))
            s = lax.dot_general(qh, kh, (((1,), (1,)), ((), ())),
                                preferred_element_type=jnp.float32) * scale + bias
            s = s - jnp.max(s, axis=-1, keepdims=True)
            p = jnp.exp(s)
            p = p / jnp.sum(p, axis=-1, keepdims=True)
            ctx = jnp.dot(p.astype(cdt), vh, preferred_element_type=jnp.float32)
            acc = acc + jnp.dot(ctx.astype(cdt), wo[lo:lo + dh, :],
                                preferred_element_type=jnp.float32)
        return acc + bo

    def ln(a, b, g, be):
        return _add_layernorm(a, b, g, be, eps)

    def one(xb, eb, dpad_b, epad_b):
        self_bias = attn_mask + jnp.where(dpad_b[None, :], NEG_INF, 0.0)
        a1 = mha_one(xb, xb, self_bias,
                     params["wq1"], params["bq1"], params["wk1"], params["bk1"],
                     params["wv1"], params["bv1"], params["wo1"], params["bo1"])
        o1 = ln(a1, xb, params["g1"], params["beta1"])
        if cross_attend:
            cross_bias = jnp.where(epad_b[None, :], NEG_INF, 0.0)
            a2 = mha_one(o1, eb, cross_bias,
                         params["wq2"], params["bq2"], params["wk2"], params["bk2"],
                         params["wv2"], params["bv2"], params["wo2"], params["bo2"])
            o2 = ln(a2, o1, params["g2"], params["beta2"])
        else:
            o2 = o1
        cdt = params["w_ff1"].dtype
        h = jnp.dot(o2.astype(cdt), params["w_ff1"],
                    preferred_element_type=jnp.float32) + params["b_ff1"]
        h = jnp.maximum(h, 0.0)
        f = jnp.dot(h.astype(cdt), params["w_ff2"],
                    preferred_element_type=jnp.float32) + params["b_ff2"]
        return ln(f, o2, params["g3"], params["beta3"])

    return jax.vmap(one)(x.astype(jnp.float32), enc_output.astype(jnp.float32),
                         dec_pad, enc_pad)


# ---------------------------------------------------------------------------
if __name__ == "__main__":
    # Small, module-consistent, lane-dense shapes. fully_connected_dim == embedding_dim is
    # required by the PyTorch module's LayerNorm(fully_connected_dim) applied to E-sized data.
    B, Sq, S_enc = 2, 8, 8
    embedding_dim = 128
    fully_connected_dim = 128
    num_heads = 4

    key = jax.random.PRNGKey(0)
    k_par, k_x, k_enc = jax.random.split(key, 3)

    params = init_decoder_layer_params(k_par, embedding_dim, fully_connected_dim,
                                       cross_attend=True)

    x = jax.random.normal(k_x, (B, Sq, embedding_dim), dtype=jnp.float32)
    enc_output = jax.random.normal(k_enc, (B, S_enc, embedding_dim), dtype=jnp.float32)

    # Causal additive attention mask [Sq, Sq]: 0 on/below diagonal, -1e9 above.
    causal = jnp.triu(jnp.ones((Sq, Sq), jnp.float32), k=1) * (-1e9)

    # Boolean key-padding masks (True = position is padding / ignored).
    dec_padding_mask = jnp.zeros((B, Sq), dtype=bool).at[1, -1].set(True)
    enc_padding_mask = jnp.zeros((B, S_enc), dtype=bool).at[0, -2:].set(True)

    out = decoder_layer_forward(params, x, enc_output, causal,
                                dec_padding_mask, enc_padding_mask,
                                num_heads=num_heads, cross_attend=True,
                                layernorm_eps=1e-6)
    out = jax.block_until_ready(out)

    ref = decoder_layer_reference(params, x, enc_output, causal,
                                  dec_padding_mask, enc_padding_mask,
                                  num_heads=num_heads, cross_attend=True, eps=1e-6)
    ref = jax.block_until_ready(ref)

    assert out.shape == (B, Sq, embedding_dim)
    assert bool(jnp.all(jnp.isfinite(out)))
    assert bool(jnp.allclose(out, ref, atol=2e-2, rtol=2e-2)), "kernel != reference"
    print("KERNEL_OK")
</pallas_src>

<mosaic_0001>
module attributes {stable_mosaic.version = 11 : i64} {
  func.func @_decoder_layer_kernel(%arg0: i32, %arg1: memref<1x8x128xf32, #tpu.memory_space<vmem>>, %arg2: memref<1x8x128xf32, #tpu.memory_space<vmem>>, %arg3: memref<8x8xf32, #tpu.memory_space<vmem>>, %arg4: memref<1x1x8xi32, #tpu.memory_space<vmem>>, %arg5: memref<1x1x8xi32, #tpu.memory_space<vmem>>, %arg6: memref<128x128xbf16, #tpu.memory_space<vmem>>, %arg7: memref<1x128xf32, #tpu.memory_space<vmem>>, %arg8: memref<128x128xbf16, #tpu.memory_space<vmem>>, %arg9: memref<1x128xf32, #tpu.memory_space<vmem>>, %arg10: memref<128x128xbf16, #tpu.memory_space<vmem>>, %arg11: memref<1x128xf32, #tpu.memory_space<vmem>>, %arg12: memref<128x128xbf16, #tpu.memory_space<vmem>>, %arg13: memref<1x128xf32, #tpu.memory_space<vmem>>, %arg14: memref<1x128xf32, #tpu.memory_space<vmem>>, %arg15: memref<1x128xf32, #tpu.memory_space<vmem>>, %arg16: memref<128x128xbf16, #tpu.memory_space<vmem>>, %arg17: memref<1x128xf32, #tpu.memory_space<vmem>>, %arg18: memref<128x128xbf16, #tpu.memory_space<vmem>>, %arg19: memref<1x128xf32, #tpu.memory_space<vmem>>, %arg20: memref<128x128xbf16, #tpu.memory_space<vmem>>, %arg21: memref<1x128xf32, #tpu.memory_space<vmem>>, %arg22: memref<128x128xbf16, #tpu.memory_space<vmem>>, %arg23: memref<1x128xf32, #tpu.memory_space<vmem>>, %arg24: memref<1x128xf32, #tpu.memory_space<vmem>>, %arg25: memref<1x128xf32, #tpu.memory_space<vmem>>, %arg26: memref<128x128xbf16, #tpu.memory_space<vmem>>, %arg27: memref<1x128xf32, #tpu.memory_space<vmem>>, %arg28: memref<128x128xbf16, #tpu.memory_space<vmem>>, %arg29: memref<1x128xf32, #tpu.memory_space<vmem>>, %arg30: memref<1x128xf32, #tpu.memory_space<vmem>>, %arg31: memref<1x128xf32, #tpu.memory_space<vmem>>, %arg32: memref<1x8x128xf32, #tpu.memory_space<vmem>>) attributes {dimension_semantics = [#tpu.dimension_semantics<parallel>], iteration_bounds = array<i64: 2>, scalar_prefetch = 0 : i64, scratch_operands = 0 : i64, tpu.core_type = #tpu.core_type<tc>, window_params = [{transform_indices = @transform_0, window_bounds = array<i64: 1, 8, 128>}, {transform_indices = @transform_1, window_bounds = array<i64: 1, 8, 128>}, {pipeline_mode = #tpu.pipeline_mode<synchronous>, transform_indices = @transform_2, window_bounds = array<i64: 8, 8>}, {transform_indices = @transform_3, window_bounds = array<i64: 1, 1, 8>}, {transform_indices = @transform_4, window_bounds = array<i64: 1, 1, 8>}, {pipeline_mode = #tpu.pipeline_mode<synchronous>, transform_indices = @transform_5, window_bounds = array<i64: 128, 128>}, {pipeline_mode = #tpu.pipeline_mode<synchronous>, transform_indices = @transform_6, window_bounds = array<i64: 1, 128>}, {pipeline_mode = #tpu.pipeline_mode<synchronous>, transform_indices = @transform_7, window_bounds = array<i64: 128, 128>}, {pipeline_mode = #tpu.pipeline_mode<synchronous>, transform_indices = @transform_8, window_bounds = array<i64: 1, 128>}, {pipeline_mode = #tpu.pipeline_mode<synchronous>, transform_indices = @transform_9, window_bounds = array<i64: 128, 128>}, {pipeline_mode = #tpu.pipeline_mode<synchronous>, transform_indices = @transform_10, window_bounds = array<i64: 1, 128>}, {pipeline_mode = #tpu.pipeline_mode<synchronous>, transform_indices = @transform_11, window_bounds = array<i64: 128, 128>}, {pipeline_mode = #tpu.pipeline_mode<synchronous>, transform_indices = @transform_12, window_bounds = array<i64: 1, 128>}, {pipeline_mode = #tpu.pipeline_mode<synchronous>, transform_indices = @transform_13, window_bounds = array<i64: 1, 128>}, {pipeline_mode = #tpu.pipeline_mode<synchronous>, transform_indices = @transform_14, window_bounds = array<i64: 1, 128>}, {pipeline_mode = #tpu.pipeline_mode<synchronous>, transform_indices = @transform_15, window_bounds = array<i64: 128, 128>}, {pipeline_mode = #tpu.pipeline_mode<synchronous>, transform_indices = @transform_16, window_bounds = array<i64: 1, 128>}, {pipeline_mode = #tpu.pipeline_mode<synchronous>, transform_indices = @transform_17, window_bounds = array<i64: 128, 128>}, {pipeline_mode = #tpu.pipeline_mode<synchronous>, transform_indices = @transform_18, window_bounds = array<i64: 1, 128>}, {pipeline_mode = #tpu.pipeline_mode<synchronous>, transform_indices = @transform_19, window_bounds = array<i64: 128, 128>}, {pipeline_mode = #tpu.pipeline_mode<synchronous>, transform_indices = @transform_20, window_bounds = array<i64: 1, 128>}, {pipeline_mode = #tpu.pipeline_mode<synchronous>, transform_indices = @transform_21, window_bounds = array<i64: 128, 128>}, {pipeline_mode = #tpu.pipeline_mode<synchronous>, transform_indices = @transform_22, window_bounds = array<i64: 1, 128>}, {pipeline_mode = #tpu.pipeline_mode<synchronous>, transform_indices = @transform_23, window_bounds = array<i64: 1, 128>}, {pipeline_mode = #tpu.pipeline_mode<synchronous>, transform_indices = @transform_24, window_bounds = array<i64: 1, 128>}, {pipeline_mode = #tpu.pipeline_mode<synchronous>, transform_indices = @transform_25, window_bounds = array<i64: 128, 128>}, {pipeline_mode = #tpu.pipeline_mode<synchronous>, transform_indices = @transform_26, window_bounds = array<i64: 1, 128>}, {pipeline_mode = #tpu.pipeline_mode<synchronous>, transform_indices = @transform_27, window_bounds = array<i64: 128, 128>}, {pipeline_mode = #tpu.pipeline_mode<synchronous>, transform_indices = @transform_28, window_bounds = array<i64: 1, 128>}, {pipeline_mode = #tpu.pipeline_mode<synchronous>, transform_indices = @transform_29, window_bounds = array<i64: 1, 128>}, {pipeline_mode = #tpu.pipeline_mode<synchronous>, transform_indices = @transform_30, window_bounds = array<i64: 1, 128>}, {transform_indices = @transform_31, window_bounds = array<i64: 1, 8, 128>}]} {
    %c0 = arith.constant 0 : index
    %c0_0 = arith.constant 0 : index
    %c0_1 = arith.constant 0 : index
    %0 = vector.load %arg1[%c0, %c0_0, %c0_1] : memref<1x8x128xf32, #tpu.memory_space<vmem>>, vector<1x8x128xf32>
    %1 = vector.shape_cast %0 : vector<1x8x128xf32> to vector<8x128xf32>
    %c0_2 = arith.constant 0 : index
    %c0_3 = arith.constant 0 : index
    %2 = vector.load %arg3[%c0_2, %c0_3] : memref<8x8xf32, #tpu.memory_space<vmem>>, vector<8x8xf32>
    %c0_4 = arith.constant 0 : index
    %c0_5 = arith.constant 0 : index
    %c0_6 = arith.constant 0 : index
    %3 = vector.load %arg4[%c0_4, %c0_5, %c0_6] : memref<1x1x8xi32, #tpu.memory_space<vmem>>, vector<1x1x8xi32>
    %4 = vector.shape_cast %3 : vector<1x1x8xi32> to vector<1x8xi32>
    %c0_i32 = arith.constant 0 : i32
    %5 = vector.broadcast %c0_i32 : i32 to vector<1x8xi32>
    %6 = arith.cmpi ne, %4, %5 : vector<1x8xi32>
    %cst = arith.constant -1.000000e+09 : f32
    %cst_7 = arith.constant 0.000000e+00 : f32
    %7 = vector.broadcast %cst : f32 to vector<1x8xf32>
    %8 = vector.broadcast %cst_7 : f32 to vector<1x8xf32>
    %9 = arith.select %6, %7, %8 : vector<1x8xi1>, vector<1x8xf32>
    %10 = vector.broadcast %9 : vector<1x8xf32> to vector<8x8xf32>
    %11 = arith.addf %2, %10 : vector<8x8xf32>
    %c0_8 = arith.constant 0 : index
    %c0_9 = arith.constant 0 : index
    %12 = vector.load %arg6[%c0_8, %c0_9] : memref<128x128xbf16, #tpu.memory_space<vmem>>, vector<128x128xbf16>
    %c0_10 = arith.constant 0 : index
    %c0_11 = arith.constant 0 : index
    %13 = vector.load %arg7[%c0_10, %c0_11] : memref<1x128xf32, #tpu.memory_space<vmem>>, vector<1x128xf32>
    %c0_12 = arith.constant 0 : index
    %c0_13 = arith.constant 0 : index
    %14 = vector.load %arg8[%c0_12, %c0_13] : memref<128x128xbf16, #tpu.memory_space<vmem>>, vector<128x128xbf16>
    %c0_14 = arith.constant 0 : index
    %c0_15 = arith.constant 0 : index
    %15 = vector.load %arg9[%c0_14, %c0_15] : memref<1x128xf32, #tpu.memory_space<vmem>>, vector<1x128xf32>
    %c0_16 = arith.constant 0 : index
    %c0_17 = arith.constant 0 : index
    %16 = vector.load %arg10[%c0_16, %c0_17] : memref<128x128xbf16, #tpu.memory_space<vmem>>, vector<128x128xbf16>
    %c0_18 = arith.constant 0 : index
    %c0_19 = arith.constant 0 : index
    %17 = vector.load %arg11[%c0_18, %c0_19] : memref<1x128xf32, #tpu.memory_space<vmem>>, vector<1x128xf32>
    %c0_20 = arith.constant 0 : index
    %c0_21 = arith.constant 0 : index
    %18 = vector.load %arg12[%c0_20, %c0_21] : memref<128x128xbf16, #tpu.memory_space<vmem>>, vector<128x128xbf16>
    %c0_22 = arith.constant 0 : index
    %c0_23 = arith.constant 0 : index
    %19 = vector.load %arg13[%c0_22, %c0_23] : memref<1x128xf32, #tpu.memory_space<vmem>>, vector<1x128xf32>
    %20 = arith.truncf %1 : vector<8x128xf32> to vector<8x128xbf16>
    %cst_24 = arith.constant dense<0.000000e+00> : vector<8x128xf32>
    %21 = tpu.matmul %20, %12, %cst_24 {dimension_numbers = #tpu.dot_dimension_numbers<[1], [0], [0], [1], [0, 0, 1, 1], [], []>} : vector<8x128xbf16>, vector<128x128xbf16>, vector<8x128xf32> -> vector<8x128xf32>
    %22 = vector.broadcast %13 : vector<1x128xf32> to vector<8x128xf32>
    %23 = arith.addf %21, %22 : vector<8x128xf32>
    %24 = arith.truncf %1 : vector<8x128xf32> to vector<8x128xbf16>
    %cst_25 = arith.constant dense<0.000000e+00> : vector<8x128xf32>
    %25 = tpu.matmul %24, %14, %cst_25 {dimension_numbers = #tpu.dot_dimension_numbers<[1], [0], [0], [1], [0, 0, 1, 1], [], []>} : vector<8x128xbf16>, vector<128x128xbf16>, vector<8x128xf32> -> vector<8x128xf32>
    %26 = vector.broadcast %15 : vector<1x128xf32> to vector<8x128xf32>
    %27 = arith.addf %25, %26 : vector<8x128xf32>
    %28 = arith.truncf %1 : vector<8x128xf32> to vector<8x128xbf16>
    %cst_26 = arith.constant dense<0.000000e+00> : vector<8x128xf32>
    %29 = tpu.matmul %28, %16, %cst_26 {dimension_numbers = #tpu.dot_dimension_numbers<[1], [0], [0], [1], [0, 0, 1, 1], [], []>} : vector<8x128xbf16>, vector<128x128xbf16>, vector<8x128xf32> -> vector<8x128xf32>
    %30 = vector.broadcast %17 : vector<1x128xf32> to vector<8x128xf32>
    %31 = arith.addf %29, %30 : vector<8x128xf32>
    %cst_27 = arith.constant 0.000000e+00 : f32
    %32 = vector.broadcast %cst_27 : f32 to vector<8x128xf32>
    %33 = vector.extract_strided_slice %23 {offsets = [0, 0], sizes = [8, 32], strides = [1, 1]} : vector<8x128xf32> to vector<8x32xf32>
    %34 = arith.truncf %33 : vector<8x32xf32> to vector<8x32xbf16>
    %35 = vector.extract_strided_slice %27 {offsets = [0, 0], sizes = [8, 32], strides = [1, 1]} : vector<8x128xf32> to vector<8x32xf32>
    %36 = arith.truncf %35 : vector<8x32xf32> to vector<8x32xbf16>
    %37 = vector.extract_strided_slice %31 {offsets = [0, 0], sizes = [8, 32], strides = [1, 1]} : vector<8x128xf32> to vector<8x32xf32>
    %38 = arith.truncf %37 : vector<8x32xf32> to vector<8x32xbf16>
    %cst_28 = arith.constant dense<0.000000e+00> : vector<8x8xf32>
    %39 = tpu.matmul %34, %36, %cst_28 {dimension_numbers = #tpu.dot_dimension_numbers<[1], [1], [0], [0], [0, 0, 1, 0], [], []>} : vector<8x32xbf16>, vector<8x32xbf16>, vector<8x8xf32> -> vector<8x8xf32>
    %cst_29 = arith.constant 0.176776692 : f32
    %40 = vector.broadcast %cst_29 : f32 to vector<8x8xf32>
    %41 = arith.mulf %39, %40 : vector<8x8xf32>
    %42 = arith.addf %41, %11 : vector<8x8xf32>
    %cst_30 = arith.constant dense<0xFF800000> : vector<8xf32>
    %43 = vector.multi_reduction <maximumf>, %42, %cst_30 [1] : vector<8x8xf32> to vector<8xf32>
    %44 = vector.shape_cast %43 : vector<8xf32> to vector<8x1xf32>
    %45 = vector.broadcast %44 : vector<8x1xf32> to vector<8x8xf32>
    %46 = arith.subf %42, %45 : vector<8x8xf32>
    %47 = math.exp %46 : vector<8x8xf32>
    %cst_31 = arith.constant dense<0.000000e+00> : vector<8xf32>
    %48 = vector.multi_reduction <add>, %47, %cst_31 [1] : vector<8x8xf32> to vector<8xf32>
    %49 = vector.shape_cast %48 : vector<8xf32> to vector<8x1xf32>
    %50 = tpu.reciprocal %49 {approx = true} : vector<8x1xf32> -> vector<8x1xf32>
    %51 = vector.broadcast %50 : vector<8x1xf32> to vector<8x8xf32>
    %52 = arith.mulf %47, %51 : vector<8x8xf32>
    %53 = arith.truncf %52 : vector<8x8xf32> to vector<8x8xbf16>
    %cst_32 = arith.constant dense<0.000000e+00> : vector<8x32xf32>
    %54 = tpu.matmul %53, %38, %cst_32 {dimension_numbers = #tpu.dot_dimension_numbers<[1], [0], [0], [1], [0, 0, 1, 1], [], []>} : vector<8x8xbf16>, vector<8x32xbf16>, vector<8x32xf32> -> vector<8x32xf32>
    %55 = arith.truncf %54 : vector<8x32xf32> to vector<8x32xbf16>
    %56 = vector.extract_strided_slice %18 {offsets = [0, 0], sizes = [32, 128], strides = [1, 1]} : vector<128x128xbf16> to vector<32x128xbf16>
    %cst_33 = arith.constant dense<0.000000e+00> : vector<8x128xf32>
    %57 = tpu.matmul %55, %56, %cst_33 {dimension_numbers = #tpu.dot_dimension_numbers<[1], [0], [0], [1], [0, 0, 1, 1], [], []>} : vector<8x32xbf16>, vector<32x128xbf16>, vector<8x128xf32> -> vector<8x128xf32>
    %58 = arith.addf %32, %57 : vector<8x128xf32>
    %59 = vector.extract_strided_slice %23 {offsets = [0, 32], sizes = [8, 32], strides = [1, 1]} : vector<8x128xf32> to vector<8x32xf32>
    %60 = arith.truncf %59 : vector<8x32xf32> to vector<8x32xbf16>
    %61 = vector.extract_strided_slice %27 {offsets = [0, 32], sizes = [8, 32], strides = [1, 1]} : vector<8x128xf32> to vector<8x32xf32>
    %62 = arith.truncf %61 : vector<8x32xf32> to vector<8x32xbf16>
    %63 = vector.extract_strided_slice %31 {offsets = [0, 32], sizes = [8, 32], strides = [1, 1]} : vector<8x128xf32> to vector<8x32xf32>
    %64 = arith.truncf %63 : vector<8x32xf32> to vector<8x32xbf16>
    %cst_34 = arith.constant dense<0.000000e+00> : vector<8x8xf32>
    %65 = tpu.matmul %60, %62, %cst_34 {dimension_numbers = #tpu.dot_dimension_numbers<[1], [1], [0], [0], [0, 0, 1, 0], [], []>} : vector<8x32xbf16>, vector<8x32xbf16>, vector<8x8xf32> -> vector<8x8xf32>
    %cst_35 = arith.constant 0.176776692 : f32
    %66 = vector.broadcast %cst_35 : f32 to vector<8x8xf32>
    %67 = arith.mulf %65, %66 : vector<8x8xf32>
    %68 = arith.addf %67, %11 : vector<8x8xf32>
    %cst_36 = arith.constant dense<0xFF800000> : vector<8xf32>
    %69 = vector.multi_reduction <maximumf>, %68, %cst_36 [1] : vector<8x8xf32> to vector<8xf32>
    %70 = vector.shape_cast %69 : vector<8xf32> to vector<8x1xf32>
    %71 = vector.broadcast %70 : vector<8x1xf32> to vector<8x8xf32>
    %72 = arith.subf %68, %71 : vector<8x8xf32>
    %73 = math.exp %72 : vector<8x8xf32>
    %cst_37 = arith.constant dense<0.000000e+00> : vector<8xf32>
    %74 = vector.multi_reduction <add>, %73, %cst_37 [1] : vector<8x8xf32> to vector<8xf32>
    %75 = vector.shape_cast %74 : vector<8xf32> to vector<8x1xf32>
    %76 = tpu.reciprocal %75 {approx = true} : vector<8x1xf32> -> vector<8x1xf32>
    %77 = vector.broadcast %76 : vector<8x1xf32> to vector<8x8xf32>
    %78 = arith.mulf %73, %77 : vector<8x8xf32>
    %79 = arith.truncf %78 : vector<8x8xf32> to vector<8x8xbf16>
    %cst_38 = arith.constant dense<0.000000e+00> : vector<8x32xf32>
    %80 = tpu.matmul %79, %64, %cst_38 {dimension_numbers = #tpu.dot_dimension_numbers<[1], [0], [0], [1], [0, 0, 1, 1], [], []>} : vector<8x8xbf16>, vector<8x32xbf16>, vector<8x32xf32> -> vector<8x32xf32>
    %81 = arith.truncf %80 : vector<8x32xf32> to vector<8x32xbf16>
    %82 = vector.extract_strided_slice %18 {offsets = [32, 0], sizes = [32, 128], strides = [1, 1]} : vector<128x128xbf16> to vector<32x128xbf16>
    %cst_39 = arith.constant dense<0.000000e+00> : vector<8x128xf32>
    %83 = tpu.matmul %81, %82, %cst_39 {dimension_numbers = #tpu.dot_dimension_numbers<[1], [0], [0], [1], [0, 0, 1, 1], [], []>} : vector<8x32xbf16>, vector<32x128xbf16>, vector<8x128xf32> -> vector<8x128xf32>
    %84 = arith.addf %58, %83 : vector<8x128xf32>
    %85 = vector.extract_strided_slice %23 {offsets = [0, 64], sizes = [8, 32], strides = [1, 1]} : vector<8x128xf32> to vector<8x32xf32>
    %86 = arith.truncf %85 : vector<8x32xf32> to vector<8x32xbf16>
    %87 = vector.extract_strided_slice %27 {offsets = [0, 64], sizes = [8, 32], strides = [1, 1]} : vector<8x128xf32> to vector<8x32xf32>
    %88 = arith.truncf %87 : vector<8x32xf32> to vector<8x32xbf16>
    %89 = vector.extract_strided_slice %31 {offsets = [0, 64], sizes = [8, 32], strides = [1, 1]} : vector<8x128xf32> to vector<8x32xf32>
    %90 = arith.truncf %89 : vector<8x32xf32> to vector<8x32xbf16>
    %cst_40 = arith.constant dense<0.000000e+00> : vector<8x8xf32>
    %91 = tpu.matmul %86, %88, %cst_40 {dimension_numbers = #tpu.dot_dimension_numbers<[1], [1], [0], [0], [0, 0, 1, 0], [], []>} : vector<8x32xbf16>, vector<8x32xbf16>, vector<8x8xf32> -> vector<8x8xf32>
    %cst_41 = arith.constant 0.176776692 : f32
    %92 = vector.broadcast %cst_41 : f32 to vector<8x8xf32>
    %93 = arith.mulf %91, %92 : vector<8x8xf32>
    %94 = arith.addf %93, %11 : vector<8x8xf32>
    %cst_42 = arith.constant dense<0xFF800000> : vector<8xf32>
    %95 = vector.multi_reduction <maximumf>, %94, %cst_42 [1] : vector<8x8xf32> to vector<8xf32>
    %96 = vector.shape_cast %95 : vector<8xf32> to vector<8x1xf32>
    %97 = vector.broadcast %96 : vector<8x1xf32> to vector<8x8xf32>
    %98 = arith.subf %94, %97 : vector<8x8xf32>
    %99 = math.exp %98 : vector<8x8xf32>
    %cst_43 = arith.constant dense<0.000000e+00> : vector<8xf32>
    %100 = vector.multi_reduction <add>, %99, %cst_43 [1] : vector<8x8xf32> to vector<8xf32>
    %101 = vector.shape_cast %100 : vector<8xf32> to vector<8x1xf32>
    %102 = tpu.reciprocal %101 {approx = true} : vector<8x1xf32> -> vector<8x1xf32>
    %103 = vector.broadcast %102 : vector<8x1xf32> to vector<8x8xf32>
    %104 = arith.mulf %99, %103 : vector<8x8xf32>
    %105 = arith.truncf %104 : vector<8x8xf32> to vector<8x8xbf16>
    %cst_44 = arith.constant dense<0.000000e+00> : vector<8x32xf32>
    %106 = tpu.matmul %105, %90, %cst_44 {dimension_numbers = #tpu.dot_dimension_numbers<[1], [0], [0], [1], [0, 0, 1, 1], [], []>} : vector<8x8xbf16>, vector<8x32xbf16>, vector<8x32xf32> -> vector<8x32xf32>
    %107 = arith.truncf %106 : vector<8x32xf32> to vector<8x32xbf16>
    %108 = vector.extract_strided_slice %18 {offsets = [64, 0], sizes = [32, 128], strides = [1, 1]} : vector<128x128xbf16> to vector<32x128xbf16>
    %cst_45 = arith.constant dense<0.000000e+00> : vector<8x128xf32>
    %109 = tpu.matmul %107, %108, %cst_45 {dimension_numbers = #tpu.dot_dimension_numbers<[1], [0], [0], [1], [0, 0, 1, 1], [], []>} : vector<8x32xbf16>, vector<32x128xbf16>, vector<8x128xf32> -> vector<8x128xf32>
    %110 = arith.addf %84, %109 : vector<8x128xf32>
    %111 = vector.extract_strided_slice %23 {offsets = [0, 96], sizes = [8, 32], strides = [1, 1]} : vector<8x128xf32> to vector<8x32xf32>
    %112 = arith.truncf %111 : vector<8x32xf32> to vector<8x32xbf16>
    %113 = vector.extract_strided_slice %27 {offsets = [0, 96], sizes = [8, 32], strides = [1, 1]} : vector<8x128xf32> to vector<8x32xf32>
    %114 = arith.truncf %113 : vector<8x32xf32> to vector<8x32xbf16>
    %115 = vector.extract_strided_slice %31 {offsets = [0, 96], sizes = [8, 32], strides = [1, 1]} : vector<8x128xf32> to vector<8x32xf32>
    %116 = arith.truncf %115 : vector<8x32xf32> to vector<8x32xbf16>
    %cst_46 = arith.constant dense<0.000000e+00> : vector<8x8xf32>
    %117 = tpu.matmul %112, %114, %cst_46 {dimension_numbers = #tpu.dot_dimension_numbers<[1], [1], [0], [0], [0, 0, 1, 0], [], []>} : vector<8x32xbf16>, vector<8x32xbf16>, vector<8x8xf32> -> vector<8x8xf32>
    %cst_47 = arith.constant 0.176776692 : f32
    %118 = vector.broadcast %cst_47 : f32 to vector<8x8xf32>
    %119 = arith.mulf %117, %118 : vector<8x8xf32>
    %120 = arith.addf %119, %11 : vector<8x8xf32>
    %cst_48 = arith.constant dense<0xFF800000> : vector<8xf32>
    %121 = vector.multi_reduction <maximumf>, %120, %cst_48 [1] : vector<8x8xf32> to vector<8xf32>
    %122 = vector.shape_cast %121 : vector<8xf32> to vector<8x1xf32>
    %123 = vector.broadcast %122 : vector<8x1xf32> to vector<8x8xf32>
    %124 = arith.subf %120, %123 : vector<8x8xf32>
    %125 = math.exp %124 : vector<8x8xf32>
    %cst_49 = arith.constant dense<0.000000e+00> : vector<8xf32>
    %126 = vector.multi_reduction <add>, %125, %cst_49 [1] : vector<8x8xf32> to vector<8xf32>
    %127 = vector.shape_cast %126 : vector<8xf32> to vector<8x1xf32>
    %128 = tpu.reciprocal %127 {approx = true} : vector<8x1xf32> -> vector<8x1xf32>
    %129 = vector.broadcast %128 : vector<8x1xf32> to vector<8x8xf32>
    %130 = arith.mulf %125, %129 : vector<8x8xf32>
    %131 = arith.truncf %130 : vector<8x8xf32> to vector<8x8xbf16>
    %cst_50 = arith.constant dense<0.000000e+00> : vector<8x32xf32>
    %132 = tpu.matmul %131, %116, %cst_50 {dimension_numbers = #tpu.dot_dimension_numbers<[1], [0], [0], [1], [0, 0, 1, 1], [], []>} : vector<8x8xbf16>, vector<8x32xbf16>, vector<8x32xf32> -> vector<8x32xf32>
    %133 = arith.truncf %132 : vector<8x32xf32> to vector<8x32xbf16>
    %134 = vector.extract_strided_slice %18 {offsets = [96, 0], sizes = [32, 128], strides = [1, 1]} : vector<128x128xbf16> to vector<32x128xbf16>
    %cst_51 = arith.constant dense<0.000000e+00> : vector<8x128xf32>
    %135 = tpu.matmul %133, %134, %cst_51 {dimension_numbers = #tpu.dot_dimension_numbers<[1], [0], [0], [1], [0, 0, 1, 1], [], []>} : vector<8x32xbf16>, vector<32x128xbf16>, vector<8x128xf32> -> vector<8x128xf32>
    %136 = arith.addf %110, %135 : vector<8x128xf32>
    %137 = vector.broadcast %19 : vector<1x128xf32> to vector<8x128xf32>
    %138 = arith.addf %136, %137 : vector<8x128xf32>
    %c0_52 = arith.constant 0 : index
    %c0_53 = arith.constant 0 : index
    %139 = vector.load %arg14[%c0_52, %c0_53] : memref<1x128xf32, #tpu.memory_space<vmem>>, vector<1x128xf32>
    %c0_54 = arith.constant 0 : index
    %c0_55 = arith.constant 0 : index
    %140 = vector.load %arg15[%c0_54, %c0_55] : memref<1x128xf32, #tpu.memory_space<vmem>>, vector<1x128xf32>
    %141 = arith.addf %138, %1 : vector<8x128xf32>
    %cst_56 = arith.constant dense<0.000000e+00> : vector<8xf32>
    %142 = vector.multi_reduction <add>, %141, %cst_56 [1] : vector<8x128xf32> to vector<8xf32>
    %143 = vector.shape_cast %142 : vector<8xf32> to vector<8x1xf32>
    %cst_57 = arith.constant 1.280000e+02 : f32
    %144 = vector.broadcast %cst_57 : f32 to vector<8x1xf32>
    %145 = arith.divf %143, %144 : vector<8x1xf32>
    %146 = vector.broadcast %145 : vector<8x1xf32> to vector<8x128xf32>
    %147 = arith.subf %141, %146 : vector<8x128xf32>
    %148 = arith.mulf %147, %147 : vector<8x128xf32>
    %cst_58 = arith.constant dense<0.000000e+00> : vector<8xf32>
    %149 = vector.multi_reduction <add>, %148, %cst_58 [1] : vector<8x128xf32> to vector<8xf32>
    %150 = vector.shape_cast %149 : vector<8xf32> to vector<8x1xf32>
    %cst_59 = arith.constant 1.280000e+02 : f32
    %151 = vector.broadcast %cst_59 : f32 to vector<8x1xf32>
    %152 = arith.divf %150, %151 : vector<8x1xf32>
    %cst_60 = arith.constant 9.99999997E-7 : f32
    %153 = vector.broadcast %cst_60 : f32 to vector<8x1xf32>
    %154 = arith.addf %152, %153 : vector<8x1xf32>
    %155 = math.rsqrt %154 : vector<8x1xf32>
    %156 = vector.broadcast %155 : vector<8x1xf32> to vector<8x128xf32>
    %157 = arith.mulf %147, %156 : vector<8x128xf32>
    %158 = vector.broadcast %139 : vector<1x128xf32> to vector<8x128xf32>
    %159 = arith.mulf %157, %158 : vector<8x128xf32>
    %160 = vector.broadcast %140 : vector<1x128xf32> to vector<8x128xf32>
    %161 = arith.addf %159, %160 : vector<8x128xf32>
    %c0_61 = arith.constant 0 : index
    %c0_62 = arith.constant 0 : index
    %c0_63 = arith.constant 0 : index
    %162 = vector.load %arg2[%c0_61, %c0_62, %c0_63] : memref<1x8x128xf32, #tpu.memory_space<vmem>>, vector<1x8x128xf32>
    %163 = vector.shape_cast %162 : vector<1x8x128xf32> to vector<8x128xf32>
    %c0_64 = arith.constant 0 : index
    %c0_65 = arith.constant 0 : index
    %c0_66 = arith.constant 0 : index
    %164 = vector.load %arg5[%c0_64, %c0_65, %c0_66] : memref<1x1x8xi32, #tpu.memory_space<vmem>>, vector<1x1x8xi32>
    %165 = vector.shape_cast %164 : vector<1x1x8xi32> to vector<1x8xi32>
    %c0_i32_67 = arith.constant 0 : i32
    %166 = vector.broadcast %c0_i32_67 : i32 to vector<1x8xi32>
    %167 = arith.cmpi ne, %165, %166 : vector<1x8xi32>
    %cst_68 = arith.constant -1.000000e+09 : f32
    %cst_69 = arith.constant 0.000000e+00 : f32
    %168 = vector.broadcast %cst_68 : f32 to vector<1x8xf32>
    %169 = vector.broadcast %cst_69 : f32 to vector<1x8xf32>
    %170 = arith.select %167, %168, %169 : vector<1x8xi1>, vector<1x8xf32>
    %c0_70 = arith.constant 0 : index
    %c0_71 = arith.constant 0 : index
    %171 = vector.load %arg16[%c0_70, %c0_71] : memref<128x128xbf16, #tpu.memory_space<vmem>>, vector<128x128xbf16>
    %c0_72 = arith.constant 0 : index
    %c0_73 = arith.constant 0 : index
    %172 = vector.load %arg17[%c0_72, %c0_73] : memref<1x128xf32, #tpu.memory_space<vmem>>, vector<1x128xf32>
    %c0_74 = arith.constant 0 : index
    %c0_75 = arith.constant 0 : index
    %173 = vector.load %arg18[%c0_74, %c0_75] : memref<128x128xbf16, #tpu.memory_space<vmem>>, vector<128x128xbf16>
    %c0_76 = arith.constant 0 : index
    %c0_77 = arith.constant 0 : index
    %174 = vector.load %arg19[%c0_76, %c0_77] : memref<1x128xf32, #tpu.memory_space<vmem>>, vector<1x128xf32>
    %c0_78 = arith.constant 0 : index
    %c0_79 = arith.constant 0 : index
    %175 = vector.load %arg20[%c0_78, %c0_79] : memref<128x128xbf16, #tpu.memory_space<vmem>>, vector<128x128xbf16>
    %c0_80 = arith.constant 0 : index
    %c0_81 = arith.constant 0 : index
    %176 = vector.load %arg21[%c0_80, %c0_81] : memref<1x128xf32, #tpu.memory_space<vmem>>, vector<1x128xf32>
    %c0_82 = arith.constant 0 : index
    %c0_83 = arith.constant 0 : index
    %177 = vector.load %arg22[%c0_82, %c0_83] : memref<128x128xbf16, #tpu.memory_space<vmem>>, vector<128x128xbf16>
    %c0_84 = arith.constant 0 : index
    %c0_85 = arith.constant 0 : index
    %178 = vector.load %arg23[%c0_84, %c0_85] : memref<1x128xf32, #tpu.memory_space<vmem>>, vector<1x128xf32>
    %179 = arith.truncf %161 : vector<8x128xf32> to vector<8x128xbf16>
    %cst_86 = arith.constant dense<0.000000e+00> : vector<8x128xf32>
    %180 = tpu.matmul %179, %171, %cst_86 {dimension_numbers = #tpu.dot_dimension_numbers<[1], [0], [0], [1], [0, 0, 1, 1], [], []>} : vector<8x128xbf16>, vector<128x128xbf16>, vector<8x128xf32> -> vector<8x128xf32>
    %181 = vector.broadcast %172 : vector<1x128xf32> to vector<8x128xf32>
    %182 = arith.addf %180, %181 : vector<8x128xf32>
    %183 = arith.truncf %163 : vector<8x128xf32> to vector<8x128xbf16>
    %cst_87 = arith.constant dense<0.000000e+00> : vector<8x128xf32>
    %184 = tpu.matmul %183, %173, %cst_87 {dimension_numbers = #tpu.dot_dimension_numbers<[1], [0], [0], [1], [0, 0, 1, 1], [], []>} : vector<8x128xbf16>, vector<128x128xbf16>, vector<8x128xf32> -> vector<8x128xf32>
    %185 = vector.broadcast %174 : vector<1x128xf32> to vector<8x128xf32>
    %186 = arith.addf %184, %185 : vector<8x128xf32>
    %187 = arith.truncf %163 : vector<8x128xf32> to vector<8x128xbf16>
    %cst_88 = arith.constant dense<0.000000e+00> : vector<8x128xf32>
    %188 = tpu.matmul %187, %175, %cst_88 {dimension_numbers = #tpu.dot_dimension_numbers<[1], [0], [0], [1], [0, 0, 1, 1], [], []>} : vector<8x128xbf16>, vector<128x128xbf16>, vector<8x128xf32> -> vector<8x128xf32>
    %189 = vector.broadcast %176 : vector<1x128xf32> to vector<8x128xf32>
    %190 = arith.addf %188, %189 : vector<8x128xf32>
    %cst_89 = arith.constant 0.000000e+00 : f32
    %191 = vector.broadcast %cst_89 : f32 to vector<8x128xf32>
    %192 = vector.extract_strided_slice %182 {offsets = [0, 0], sizes = [8, 32], strides = [1, 1]} : vector<8x128xf32> to vector<8x32xf32>
    %193 = arith.truncf %192 : vector<8x32xf32> to vector<8x32xbf16>
    %194 = vector.extract_strided_slice %186 {offsets = [0, 0], sizes = [8, 32], strides = [1, 1]} : vector<8x128xf32> to vector<8x32xf32>
    %195 = arith.truncf %194 : vector<8x32xf32> to vector<8x32xbf16>
    %196 = vector.extract_strided_slice %190 {offsets = [0, 0], sizes = [8, 32], strides = [1, 1]} : vector<8x128xf32> to vector<8x32xf32>
    %197 = arith.truncf %196 : vector<8x32xf32> to vector<8x32xbf16>
    %cst_90 = arith.constant dense<0.000000e+00> : vector<8x8xf32>
    %198 = tpu.matmul %193, %195, %cst_90 {dimension_numbers = #tpu.dot_dimension_numbers<[1], [1], [0], [0], [0, 0, 1, 0], [], []>} : vector<8x32xbf16>, vector<8x32xbf16>, vector<8x8xf32> -> vector<8x8xf32>
    %cst_91 = arith.constant 0.176776692 : f32
    %199 = vector.broadcast %cst_91 : f32 to vector<8x8xf32>
    %200 = arith.mulf %198, %199 : vector<8x8xf32>
    %201 = vector.broadcast %170 : vector<1x8xf32> to vector<8x8xf32>
    %202 = arith.addf %200, %201 : vector<8x8xf32>
    %cst_92 = arith.constant dense<0xFF800000> : vector<8xf32>
    %203 = vector.multi_reduction <maximumf>, %202, %cst_92 [1] : vector<8x8xf32> to vector<8xf32>
    %204 = vector.shape_cast %203 : vector<8xf32> to vector<8x1xf32>
    %205 = vector.broadcast %204 : vector<8x1xf32> to vector<8x8xf32>
    %206 = arith.subf %202, %205 : vector<8x8xf32>
    %207 = math.exp %206 : vector<8x8xf32>
    %cst_93 = arith.constant dense<0.000000e+00> : vector<8xf32>
    %208 = vector.multi_reduction <add>, %207, %cst_93 [1] : vector<8x8xf32> to vector<8xf32>
    %209 = vector.shape_cast %208 : vector<8xf32> to vector<8x1xf32>
    %210 = tpu.reciprocal %209 {approx = true} : vector<8x1xf32> -> vector<8x1xf32>
    %211 = vector.broadcast %210 : vector<8x1xf32> to vector<8x8xf32>
    %212 = arith.mulf %207, %211 : vector<8x8xf32>
    %213 = arith.truncf %212 : vector<8x8xf32> to vector<8x8xbf16>
    %cst_94 = arith.constant dense<0.000000e+00> : vector<8x32xf32>
    %214 = tpu.matmul %213, %197, %cst_94 {dimension_numbers = #tpu.dot_dimension_numbers<[1], [0], [0], [1], [0, 0, 1, 1], [], []>} : vector<8x8xbf16>, vector<8x32xbf16>, vector<8x32xf32> -> vector<8x32xf32>
    %215 = arith.truncf %214 : vector<8x32xf32> to vector<8x32xbf16>
    %216 = vector.extract_strided_slice %177 {offsets = [0, 0], sizes = [32, 128], strides = [1, 1]} : vector<128x128xbf16> to vector<32x128xbf16>
    %cst_95 = arith.constant dense<0.000000e+00> : vector<8x128xf32>
    %217 = tpu.matmul %215, %216, %cst_95 {dimension_numbers = #tpu.dot_dimension_numbers<[1], [0], [0], [1], [0, 0, 1, 1], [], []>} : vector<8x32xbf16>, vector<32x128xbf16>, vector<8x128xf32> -> vector<8x128xf32>
    %218 = arith.addf %191, %217 : vector<8x128xf32>
    %219 = vector.extract_strided_slice %182 {offsets = [0, 32], sizes = [8, 32], strides = [1, 1]} : vector<8x128xf32> to vector<8x32xf32>
    %220 = arith.truncf %219 : vector<8x32xf32> to vector<8x32xbf16>
    %221 = vector.extract_strided_slice %186 {offsets = [0, 32], sizes = [8, 32], strides = [1, 1]} : vector<8x128xf32> to vector<8x32xf32>
    %222 = arith.truncf %221 : vector<8x32xf32> to vector<8x32xbf16>
    %223 = vector.extract_strided_slice %190 {offsets = [0, 32], sizes = [8, 32], strides = [1, 1]} : vector<8x128xf32> to vector<8x32xf32>
    %224 = arith.truncf %223 : vector<8x32xf32> to vector<8x32xbf16>
    %cst_96 = arith.constant dense<0.000000e+00> : vector<8x8xf32>
    %225 = tpu.matmul %220, %222, %cst_96 {dimension_numbers = #tpu.dot_dimension_numbers<[1], [1], [0], [0], [0, 0, 1, 0], [], []>} : vector<8x32xbf16>, vector<8x32xbf16>, vector<8x8xf32> -> vector<8x8xf32>
    %cst_97 = arith.constant 0.176776692 : f32
    %226 = vector.broadcast %cst_97 : f32 to vector<8x8xf32>
    %227 = arith.mulf %225, %226 : vector<8x8xf32>
    %228 = vector.broadcast %170 : vector<1x8xf32> to vector<8x8xf32>
    %229 = arith.addf %227, %228 : vector<8x8xf32>
    %cst_98 = arith.constant dense<0xFF800000> : vector<8xf32>
    %230 = vector.multi_reduction <maximumf>, %229, %cst_98 [1] : vector<8x8xf32> to vector<8xf32>
    %231 = vector.shape_cast %230 : vector<8xf32> to vector<8x1xf32>
    %232 = vector.broadcast %231 : vector<8x1xf32> to vector<8x8xf32>
    %233 = arith.subf %229, %232 : vector<8x8xf32>
    %234 = math.exp %233 : vector<8x8xf32>
    %cst_99 = arith.constant dense<0.000000e+00> : vector<8xf32>
    %235 = vector.multi_reduction <add>, %234, %cst_99 [1] : vector<8x8xf32> to vector<8xf32>
    %236 = vector.shape_cast %235 : vector<8xf32> to vector<8x1xf32>
    %237 = tpu.reciprocal %236 {approx = true} : vector<8x1xf32> -> vector<8x1xf32>
    %238 = vector.broadcast %237 : vector<8x1xf32> to vector<8x8xf32>
    %239 = arith.mulf %234, %238 : vector<8x8xf32>
    %240 = arith.truncf %239 : vector<8x8xf32> to vector<8x8xbf16>
    %cst_100 = arith.constant dense<0.000000e+00> : vector<8x32xf32>
    %241 = tpu.matmul %240, %224, %cst_100 {dimension_numbers = #tpu.dot_dimension_numbers<[1], [0], [0], [1], [0, 0, 1, 1], [], []>} : vector<8x8xbf16>, vector<8x32xbf16>, vector<8x32xf32> -> vector<8x32xf32>
    %242 = arith.truncf %241 : vector<8x32xf32> to vector<8x32xbf16>
    %243 = vector.extract_strided_slice %177 {offsets = [32, 0], sizes = [32, 128], strides = [1, 1]} : vector<128x128xbf16> to vector<32x128xbf16>
    %cst_101 = arith.constant dense<0.000000e+00> : vector<8x128xf32>
    %244 = tpu.matmul %242, %243, %cst_101 {dimension_numbers = #tpu.dot_dimension_numbers<[1], [0], [0], [1], [0, 0, 1, 1], [], []>} : vector<8x32xbf16>, vector<32x128xbf16>, vector<8x128xf32> -> vector<8x128xf32>
    %245 = arith.addf %218, %244 : vector<8x128xf32>
    %246 = vector.extract_strided_slice %182 {offsets = [0, 64], sizes = [8, 32], strides = [1, 1]} : vector<8x128xf32> to vector<8x32xf32>
    %247 = arith.truncf %246 : vector<8x32xf32> to vector<8x32xbf16>
    %248 = vector.extract_strided_slice %186 {offsets = [0, 64], sizes = [8, 32], strides = [1, 1]} : vector<8x128xf32> to vector<8x32xf32>
    %249 = arith.truncf %248 : vector<8x32xf32> to vector<8x32xbf16>
    %250 = vector.extract_strided_slice %190 {offsets = [0, 64], sizes = [8, 32], strides = [1, 1]} : vector<8x128xf32> to vector<8x32xf32>
    %251 = arith.truncf %250 : vector<8x32xf32> to vector<8x32xbf16>
    %cst_102 = arith.constant dense<0.000000e+00> : vector<8x8xf32>
    %252 = tpu.matmul %247, %249, %cst_102 {dimension_numbers = #tpu.dot_dimension_numbers<[1], [1], [0], [0], [0, 0, 1, 0], [], []>} : vector<8x32xbf16>, vector<8x32xbf16>, vector<8x8xf32> -> vector<8x8xf32>
    %cst_103 = arith.constant 0.176776692 : f32
    %253 = vector.broadcast %cst_103 : f32 to vector<8x8xf32>
    %254 = arith.mulf %252, %253 : vector<8x8xf32>
    %255 = vector.broadcast %170 : vector<1x8xf32> to vector<8x8xf32>
    %256 = arith.addf %254, %255 : vector<8x8xf32>
    %cst_104 = arith.constant dense<0xFF800000> : vector<8xf32>
    %257 = vector.multi_reduction <maximumf>, %256, %cst_104 [1] : vector<8x8xf32> to vector<8xf32>
    %258 = vector.shape_cast %257 : vector<8xf32> to vector<8x1xf32>
    %259 = vector.broadcast %258 : vector<8x1xf32> to vector<8x8xf32>
    %260 = arith.subf %256, %259 : vector<8x8xf32>
    %261 = math.exp %260 : vector<8x8xf32>
    %cst_105 = arith.constant dense<0.000000e+00> : vector<8xf32>
    %262 = vector.multi_reduction <add>, %261, %cst_105 [1] : vector<8x8xf32> to vector<8xf32>
    %263 = vector.shape_cast %262 : vector<8xf32> to vector<8x1xf32>
    %264 = tpu.reciprocal %263 {approx = true} : vector<8x1xf32> -> vector<8x1xf32>
    %265 = vector.broadcast %264 : vector<8x1xf32> to vector<8x8xf32>
    %266 = arith.mulf %261, %265 : vector<8x8xf32>
    %267 = arith.truncf %266 : vector<8x8xf32> to vector<8x8xbf16>
    %cst_106 = arith.constant dense<0.000000e+00> : vector<8x32xf32>
    %268 = tpu.matmul %267, %251, %cst_106 {dimension_numbers = #tpu.dot_dimension_numbers<[1], [0], [0], [1], [0, 0, 1, 1], [], []>} : vector<8x8xbf16>, vector<8x32xbf16>, vector<8x32xf32> -> vector<8x32xf32>
    %269 = arith.truncf %268 : vector<8x32xf32> to vector<8x32xbf16>
    %270 = vector.extract_strided_slice %177 {offsets = [64, 0], sizes = [32, 128], strides = [1, 1]} : vector<128x128xbf16> to vector<32x128xbf16>
    %cst_107 = arith.constant dense<0.000000e+00> : vector<8x128xf32>
    %271 = tpu.matmul %269, %270, %cst_107 {dimension_numbers = #tpu.dot_dimension_numbers<[1], [0], [0], [1], [0, 0, 1, 1], [], []>} : vector<8x32xbf16>, vector<32x128xbf16>, vector<8x128xf32> -> vector<8x128xf32>
    %272 = arith.addf %245, %271 : vector<8x128xf32>
    %273 = vector.extract_strided_slice %182 {offsets = [0, 96], sizes = [8, 32], strides = [1, 1]} : vector<8x128xf32> to vector<8x32xf32>
    %274 = arith.truncf %273 : vector<8x32xf32> to vector<8x32xbf16>
    %275 = vector.extract_strided_slice %186 {offsets = [0, 96], sizes = [8, 32], strides = [1, 1]} : vector<8x128xf32> to vector<8x32xf32>
    %276 = arith.truncf %275 : vector<8x32xf32> to vector<8x32xbf16>
    %277 = vector.extract_strided_slice %190 {offsets = [0, 96], sizes = [8, 32], strides = [1, 1]} : vector<8x128xf32> to vector<8x32xf32>
    %278 = arith.truncf %277 : vector<8x32xf32> to vector<8x32xbf16>
    %cst_108 = arith.constant dense<0.000000e+00> : vector<8x8xf32>
    %279 = tpu.matmul %274, %276, %cst_108 {dimension_numbers = #tpu.dot_dimension_numbers<[1], [1], [0], [0], [0, 0, 1, 0], [], []>} : vector<8x32xbf16>, vector<8x32xbf16>, vector<8x8xf32> -> vector<8x8xf32>
    %cst_109 = arith.constant 0.176776692 : f32
    %280 = vector.broadcast %cst_109 : f32 to vector<8x8xf32>
    %281 = arith.mulf %279, %280 : vector<8x8xf32>
    %282 = vector.broadcast %170 : vector<1x8xf32> to vector<8x8xf32>
    %283 = arith.addf %281, %282 : vector<8x8xf32>
    %cst_110 = arith.constant dense<0xFF800000> : vector<8xf32>
    %284 = vector.multi_reduction <maximumf>, %283, %cst_110 [1] : vector<8x8xf32> to vector<8xf32>
    %285 = vector.shape_cast %284 : vector<8xf32> to vector<8x1xf32>
    %286 = vector.broadcast %285 : vector<8x1xf32> to vector<8x8xf32>
    %287 = arith.subf %283, %286 : vector<8x8xf32>
    %288 = math.exp %287 : vector<8x8xf32>
    %cst_111 = arith.constant dense<0.000000e+00> : vector<8xf32>
    %289 = vector.multi_reduction <add>, %288, %cst_111 [1] : vector<8x8xf32> to vector<8xf32>
    %290 = vector.shape_cast %289 : vector<8xf32> to vector<8x1xf32>
    %291 = tpu.reciprocal %290 {approx = true} : vector<8x1xf32> -> vector<8x1xf32>
    %292 = vector.broadcast %291 : vector<8x1xf32> to vector<8x8xf32>
    %293 = arith.mulf %288, %292 : vector<8x8xf32>
    %294 = arith.truncf %293 : vector<8x8xf32> to vector<8x8xbf16>
    %cst_112 = arith.constant dense<0.000000e+00> : vector<8x32xf32>
    %295 = tpu.matmul %294, %278, %cst_112 {dimension_numbers = #tpu.dot_dimension_numbers<[1], [0], [0], [1], [0, 0, 1, 1], [], []>} : vector<8x8xbf16>, vector<8x32xbf16>, vector<8x32xf32> -> vector<8x32xf32>
    %296 = arith.truncf %295 : vector<8x32xf32> to vector<8x32xbf16>
    %297 = vector.extract_strided_slice %177 {offsets = [96, 0], sizes = [32, 128], strides = [1, 1]} : vector<128x128xbf16> to vector<32x128xbf16>
    %cst_113 = arith.constant dense<0.000000e+00> : vector<8x128xf32>
    %298 = tpu.matmul %296, %297, %cst_113 {dimension_numbers = #tpu.dot_dimension_numbers<[1], [0], [0], [1], [0, 0, 1, 1], [], []>} : vector<8x32xbf16>, vector<32x128xbf16>, vector<8x128xf32> -> vector<8x128xf32>
    %299 = arith.addf %272, %298 : vector<8x128xf32>
    %300 = vector.broadcast %178 : vector<1x128xf32> to vector<8x128xf32>
    %301 = arith.addf %299, %300 : vector<8x128xf32>
    %c0_114 = arith.constant 0 : index
    %c0_115 = arith.constant 0 : index
    %302 = vector.load %arg24[%c0_114, %c0_115] : memref<1x128xf32, #tpu.memory_space<vmem>>, vector<1x128xf32>
    %c0_116 = arith.constant 0 : index
    %c0_117 = arith.constant 0 : index
    %303 = vector.load %arg25[%c0_116, %c0_117] : memref<1x128xf32, #tpu.memory_space<vmem>>, vector<1x128xf32>
    %304 = arith.addf %301, %161 : vector<8x128xf32>
    %cst_118 = arith.constant dense<0.000000e+00> : vector<8xf32>
    %305 = vector.multi_reduction <add>, %304, %cst_118 [1] : vector<8x128xf32> to vector<8xf32>
    %306 = vector.shape_cast %305 : vector<8xf32> to vector<8x1xf32>
    %cst_119 = arith.constant 1.280000e+02 : f32
    %307 = vector.broadcast %cst_119 : f32 to vector<8x1xf32>
    %308 = arith.divf %306, %307 : vector<8x1xf32>
    %309 = vector.broadcast %308 : vector<8x1xf32> to vector<8x128xf32>
    %310 = arith.subf %304, %309 : vector<8x128xf32>
    %311 = arith.mulf %310, %310 : vector<8x128xf32>
    %cst_120 = arith.constant dense<0.000000e+00> : vector<8xf32>
    %312 = vector.multi_reduction <add>, %311, %cst_120 [1] : vector<8x128xf32> to vector<8xf32>
    %313 = vector.shape_cast %312 : vector<8xf32> to vector<8x1xf32>
    %cst_121 = arith.constant 1.280000e+02 : f32
    %314 = vector.broadcast %cst_121 : f32 to vector<8x1xf32>
    %315 = arith.divf %313, %314 : vector<8x1xf32>
    %cst_122 = arith.constant 9.99999997E-7 : f32
    %316 = vector.broadcast %cst_122 : f32 to vector<8x1xf32>
    %317 = arith.addf %315, %316 : vector<8x1xf32>
    %318 = math.rsqrt %317 : vector<8x1xf32>
    %319 = vector.broadcast %318 : vector<8x1xf32> to vector<8x128xf32>
    %320 = arith.mulf %310, %319 : vector<8x128xf32>
    %321 = vector.broadcast %302 : vector<1x128xf32> to vector<8x128xf32>
    %322 = arith.mulf %320, %321 : vector<8x128xf32>
    %323 = vector.broadcast %303 : vector<1x128xf32> to vector<8x128xf32>
    %324 = arith.addf %322, %323 : vector<8x128xf32>
    %c0_123 = arith.constant 0 : index
    %c0_124 = arith.constant 0 : index
    %325 = vector.load %arg26[%c0_123, %c0_124] : memref<128x128xbf16, #tpu.memory_space<vmem>>, vector<128x128xbf16>
    %c0_125 = arith.constant 0 : index
    %c0_126 = arith.constant 0 : index
    %326 = vector.load %arg28[%c0_125, %c0_126] : memref<128x128xbf16, #tpu.memory_space<vmem>>, vector<128x128xbf16>
    %327 = arith.truncf %324 : vector<8x128xf32> to vector<8x128xbf16>
    %cst_127 = arith.constant dense<0.000000e+00> : vector<8x128xf32>
    %328 = tpu.matmul %327, %325, %cst_127 {dimension_numbers = #tpu.dot_dimension_numbers<[1], [0], [0], [1], [0, 0, 1, 1], [], []>} : vector<8x128xbf16>, vector<128x128xbf16>, vector<8x128xf32> -> vector<8x128xf32>
    %c0_128 = arith.constant 0 : index
    %c0_129 = arith.constant 0 : index
    %329 = vector.load %arg27[%c0_128, %c0_129] : memref<1x128xf32, #tpu.memory_space<vmem>>, vector<1x128xf32>
    %330 = vector.broadcast %329 : vector<1x128xf32> to vector<8x128xf32>
    %331 = arith.addf %328, %330 : vector<8x128xf32>
    %cst_130 = arith.constant 0.000000e+00 : f32
    %332 = vector.broadcast %cst_130 : f32 to vector<8x128xf32>
    %333 = arith.maximumf %331, %332 : vector<8x128xf32>
    %334 = arith.truncf %333 : vector<8x128xf32> to vector<8x128xbf16>
    %cst_131 = arith.constant dense<0.000000e+00> : vector<8x128xf32>
    %335 = tpu.matmul %334, %326, %cst_131 {dimension_numbers = #tpu.dot_dimension_numbers<[1], [0], [0], [1], [0, 0, 1, 1], [], []>} : vector<8x128xbf16>, vector<128x128xbf16>, vector<8x128xf32> -> vector<8x128xf32>
    %c0_132 = arith.constant 0 : index
    %c0_133 = arith.constant 0 : index
    %336 = vector.load %arg29[%c0_132, %c0_133] : memref<1x128xf32, #tpu.memory_space<vmem>>, vector<1x128xf32>
    %337 = vector.broadcast %336 : vector<1x128xf32> to vector<8x128xf32>
    %338 = arith.addf %335, %337 : vector<8x128xf32>
    %c0_134 = arith.constant 0 : index
    %c0_135 = arith.constant 0 : index
    %339 = vector.load %arg30[%c0_134, %c0_135] : memref<1x128xf32, #tpu.memory_space<vmem>>, vector<1x128xf32>
    %c0_136 = arith.constant 0 : index
    %c0_137 = arith.constant 0 : index
    %340 = vector.load %arg31[%c0_136, %c0_137] : memref<1x128xf32, #tpu.memory_space<vmem>>, vector<1x128xf32>
    %341 = arith.addf %338, %324 : vector<8x128xf32>
    %cst_138 = arith.constant dense<0.000000e+00> : vector<8xf32>
    %342 = vector.multi_reduction <add>, %341, %cst_138 [1] : vector<8x128xf32> to vector<8xf32>
    %343 = vector.shape_cast %342 : vector<8xf32> to vector<8x1xf32>
    %cst_139 = arith.constant 1.280000e+02 : f32
    %344 = vector.broadcast %cst_139 : f32 to vector<8x1xf32>
    %345 = arith.divf %343, %344 : vector<8x1xf32>
    %346 = vector.broadcast %345 : vector<8x1xf32> to vector<8x128xf32>
    %347 = arith.subf %341, %346 : vector<8x128xf32>
    %348 = arith.mulf %347, %347 : vector<8x128xf32>
    %cst_140 = arith.constant dense<0.000000e+00> : vector<8xf32>
    %349 = vector.multi_reduction <add>, %348, %cst_140 [1] : vector<8x128xf32> to vector<8xf32>
    %350 = vector.shape_cast %349 : vector<8xf32> to vector<8x1xf32>
    %cst_141 = arith.constant 1.280000e+02 : f32
    %351 = vector.broadcast %cst_141 : f32 to vector<8x1xf32>
    %352 = arith.divf %350, %351 : vector<8x1xf32>
    %cst_142 = arith.constant 9.99999997E-7 : f32
    %353 = vector.broadcast %cst_142 : f32 to vector<8x1xf32>
    %354 = arith.addf %352, %353 : vector<8x1xf32>
    %355 = math.rsqrt %354 : vector<8x1xf32>
    %356 = vector.broadcast %355 : vector<8x1xf32> to vector<8x128xf32>
    %357 = arith.mulf %347, %356 : vector<8x128xf32>
    %358 = vector.broadcast %339 : vector<1x128xf32> to vector<8x128xf32>
    %359 = arith.mulf %357, %358 : vector<8x128xf32>
    %360 = vector.broadcast %340 : vector<1x128xf32> to vector<8x128xf32>
    %361 = arith.addf %359, %360 : vector<8x128xf32>
    %c0_143 = arith.constant 0 : index
    %c0_144 = arith.constant 0 : index
    %c0_145 = arith.constant 0 : index
    %362 = vector.load %arg32[%c0_143, %c0_144, %c0_145] : memref<1x8x128xf32, #tpu.memory_space<vmem>>, vector<1x8x128xf32>
    %363 = vector.shape_cast %362 : vector<1x8x128xf32> to vector<8x128xf32>
    %364 = vector.shape_cast %361 : vector<8x128xf32> to vector<1x8x128xf32>
    tpu.vector_store %arg32[%c0_143, %c0_144, %c0_145], %364 {strides = array<i32>} : memref<1x8x128xf32, #tpu.memory_space<vmem>>, vector<1x8x128xf32>,
    return
  }
  func.func @transform_0(%arg0: i32) -> (i32, i32, i32) {
    %c0_i32 = arith.constant 0 : i32
    %c0_i32_0 = arith.constant 0 : i32
    %c0_i32_1 = arith.constant 0 : i32
    return %arg0, %c0_i32, %c0_i32_0 : i32, i32, i32
  }
  func.func @transform_1(%arg0: i32) -> (i32, i32, i32) {
    %c0_i32 = arith.constant 0 : i32
    %c0_i32_0 = arith.constant 0 : i32
    %c0_i32_1 = arith.constant 0 : i32
    return %arg0, %c0_i32, %c0_i32_0 : i32, i32, i32
  }
  func.func @transform_2(%arg0: i32) -> (i32, i32) {
    %c0_i32 = arith.constant 0 : i32
    %c0_i32_0 = arith.constant 0 : i32
    %c0_i32_1 = arith.constant 0 : i32
    return %c0_i32, %c0_i32_0 : i32, i32
  }
  func.func @transform_3(%arg0: i32) -> (i32, i32, i32) {
    %c0_i32 = arith.constant 0 : i32
    %c0_i32_0 = arith.constant 0 : i32
    %c0_i32_1 = arith.constant 0 : i32
    return %arg0, %c0_i32, %c0_i32_0 : i32, i32, i32
  }
  func.func @transform_4(%arg0: i32) -> (i32, i32, i32) {
    %c0_i32 = arith.constant 0 : i32
    %c0_i32_0 = arith.constant 0 : i32
    %c0_i32_1 = arith.constant 0 : i32
    return %arg0, %c0_i32, %c0_i32_0 : i32, i32, i32
  }
  func.func @transform_5(%arg0: i32) -> (i32, i32) {
    %c0_i32 = arith.constant 0 : i32
    %c0_i32_0 = arith.constant 0 : i32
    %c0_i32_1 = arith.constant 0 : i32
    return %c0_i32, %c0_i32_0 : i32, i32
  }
  func.func @transform_6(%arg0: i32) -> (i32, i32) {
    %c0_i32 = arith.constant 0 : i32
    %c0_i32_0 = arith.constant 0 : i32
    %c0_i32_1 = arith.constant 0 : i32
    return %c0_i32, %c0_i32_0 : i32, i32
  }
  func.func @transform_7(%arg0: i32) -> (i32, i32) {
    %c0_i32 = arith.constant 0 : i32
    %c0_i32_0 = arith.constant 0 : i32
    %c0_i32_1 = arith.constant 0 : i32
    return %c0_i32, %c0_i32_0 : i32, i32
  }
  func.func @transform_8(%arg0: i32) -> (i32, i32) {
    %c0_i32 = arith.constant 0 : i32
    %c0_i32_0 = arith.constant 0 : i32
    %c0_i32_1 = arith.constant 0 : i32
    return %c0_i32, %c0_i32_0 : i32, i32
  }
  func.func @transform_9(%arg0: i32) -> (i32, i32) {
    %c0_i32 = arith.constant 0 : i32
    %c0_i32_0 = arith.constant 0 : i32
    %c0_i32_1 = arith.constant 0 : i32
    return %c0_i32, %c0_i32_0 : i32, i32
  }
  func.func @transform_10(%arg0: i32) -> (i32, i32) {
    %c0_i32 = arith.constant 0 : i32
    %c0_i32_0 = arith.constant 0 : i32
    %c0_i32_1 = arith.constant 0 : i32
    return %c0_i32, %c0_i32_0 : i32, i32
  }
  func.func @transform_11(%arg0: i32) -> (i32, i32) {
    %c0_i32 = arith.constant 0 : i32
    %c0_i32_0 = arith.constant 0 : i32
    %c0_i32_1 = arith.constant 0 : i32
    return %c0_i32, %c0_i32_0 : i32, i32
  }
  func.func @transform_12(%arg0: i32) -> (i32, i32) {
    %c0_i32 = arith.constant 0 : i32
    %c0_i32_0 = arith.constant 0 : i32
    %c0_i32_1 = arith.constant 0 : i32
    return %c0_i32, %c0_i32_0 : i32, i32
  }
  func.func @transform_13(%arg0: i32) -> (i32, i32) {
    %c0_i32 = arith.constant 0 : i32
    %c0_i32_0 = arith.constant 0 : i32
    %c0_i32_1 = arith.constant 0 : i32
    return %c0_i32, %c0_i32_0 : i32, i32
  }
  func.func @transform_14(%arg0: i32) -> (i32, i32) {
    %c0_i32 = arith.constant 0 : i32
    %c0_i32_0 = arith.constant 0 : i32
    %c0_i32_1 = arith.constant 0 : i32
    return %c0_i32, %c0_i32_0 : i32, i32
  }
  func.func @transform_15(%arg0: i32) -> (i32, i32) {
    %c0_i32 = arith.constant 0 : i32
    %c0_i32_0 = arith.constant 0 : i32
    %c0_i32_1 = arith.constant 0 : i32
    return %c0_i32, %c0_i32_0 : i32, i32
  }
  func.func @transform_16(%arg0: i32) -> (i32, i32) {
    %c0_i32 = arith.constant 0 : i32
    %c0_i32_0 = arith.constant 0 : i32
    %c0_i32_1 = arith.constant 0 : i32
    return %c0_i32, %c0_i32_0 : i32, i32
  }
  func.func @transform_17(%arg0: i32) -> (i32, i32) {
    %c0_i32 = arith.constant 0 : i32
    %c0_i32_0 = arith.constant 0 : i32
    %c0_i32_1 = arith.constant 0 : i32
    return %c0_i32, %c0_i32_0 : i32, i32
  }
  func.func @transform_18(%arg0: i32) -> (i32, i32) {
    %c0_i32 = arith.constant 0 : i32
    %c0_i32_0 = arith.constant 0 : i32
    %c0_i32_1 = arith.constant 0 : i32
    return %c0_i32, %c0_i32_0 : i32, i32
  }
  func.func @transform_19(%arg0: i32) -> (i32, i32) {
    %c0_i32 = arith.constant 0 : i32
    %c0_i32_0 = arith.constant 0 : i32
    %c0_i32_1 = arith.constant 0 : i32
    return %c0_i32, %c0_i32_0 : i32, i32
  }
  func.func @transform_20(%arg0: i32) -> (i32, i32) {
    %c0_i32 = arith.constant 0 : i32
    %c0_i32_0 = arith.constant 0 : i32
    %c0_i32_1 = arith.constant 0 : i32
    return %c0_i32, %c0_i32_0 : i32, i32
  }
  func.func @transform_21(%arg0: i32) -> (i32, i32) {
    %c0_i32 = arith.constant 0 : i32
    %c0_i32_0 = arith.constant 0 : i32
    %c0_i32_1 = arith.constant 0 : i32
    return %c0_i32, %c0_i32_0 : i32, i32
  }
  func.func @transform_22(%arg0: i32) -> (i32, i32) {
    %c0_i32 = arith.constant 0 : i32
    %c0_i32_0 = arith.constant 0 : i32
    %c0_i32_1 = arith.constant 0 : i32
    return %c0_i32, %c0_i32_0 : i32, i32
  }
  func.func @transform_23(%arg0: i32) -> (i32, i32) {
    %c0_i32 = arith.constant 0 : i32
    %c0_i32_0 = arith.constant 0 : i32
    %c0_i32_1 = arith.constant 0 : i32
    return %c0_i32, %c0_i32_0 : i32, i32
  }
  func.func @transform_24(%arg0: i32) -> (i32, i32) {
    %c0_i32 = arith.constant 0 : i32
    %c0_i32_0 = arith.constant 0 : i32
    %c0_i32_1 = arith.constant 0 : i32
    return %c0_i32, %c0_i32_0 : i32, i32
  }
  func.func @transform_25(%arg0: i32) -> (i32, i32) {
    %c0_i32 = arith.constant 0 : i32
    %c0_i32_0 = arith.constant 0 : i32
    %c0_i32_1 = arith.constant 0 : i32
    return %c0_i32, %c0_i32_0 : i32, i32
  }
  func.func @transform_26(%arg0: i32) -> (i32, i32) {
    %c0_i32 = arith.constant 0 : i32
    %c0_i32_0 = arith.constant 0 : i32
    %c0_i32_1 = arith.constant 0 : i32
    return %c0_i32, %c0_i32_0 : i32, i32
  }
  func.func @transform_27(%arg0: i32) -> (i32, i32) {
    %c0_i32 = arith.constant 0 : i32
    %c0_i32_0 = arith.constant 0 : i32
    %c0_i32_1 = arith.constant 0 : i32
    return %c0_i32, %c0_i32_0 : i32, i32
  }
  func.func @transform_28(%arg0: i32) -> (i32, i32) {
    %c0_i32 = arith.constant 0 : i32
    %c0_i32_0 = arith.constant 0 : i32
    %c0_i32_1 = arith.constant 0 : i32
    return %c0_i32, %c0_i32_0 : i32, i32
  }
  func.func @transform_29(%arg0: i32) -> (i32, i32) {
    %c0_i32 = arith.constant 0 : i32
    %c0_i32_0 = arith.constant 0 : i32
    %c0_i32_1 = arith.constant 0 : i32
    return %c0_i32, %c0_i32_0 : i32, i32
  }
  func.func @transform_30(%arg0: i32) -> (i32, i32) {
    %c0_i32 = arith.constant 0 : i32
    %c0_i32_0 = arith.constant 0 : i32
    %c0_i32_1 = arith.constant 0 : i32
    return %c0_i32, %c0_i32_0 : i32, i32
  }
  func.func @transform_31(%arg0: i32) -> (i32, i32, i32) {
    %c0_i32 = arith.constant 0 : i32
    %c0_i32_0 = arith.constant 0 : i32
    %c0_i32_1 = arith.constant 0 : i32
    return %arg0, %c0_i32, %c0_i32_0 : i32, i32, i32
  }
}

</mosaic_0001>

<bundles_post_ra>
// kernel: tpu_custom_call.1
= control target key start
LH: loop header
LB: loop body
LE: loop exit
PB: predicated region body
PF: predicated region fallthrough
CT: control target
= control target key end

     0   :  { %s4278_s6 = smov 1   ;;  %s4279_s10 = smov 2   ;;  %s4993_s0 = inlined_call_operand.smem [shape: u32[32], index: -1, kind: input, shape index: {}] }
   0x1   :  { %s4335_s5 = sld [smem:[%s4993_s0]]   ;;  %s4280_s14 = smov 3  }
   0x2   :  { %s4340_s9 = sld [smem:[%s4993_s0 + %s4278_s6]]   ;;  %s4281_s18 = smov 4  }
   0x3   :  { %s4345_s13 = sld [smem:[%s4993_s0 + %s4279_s10]]   ;;  %s4282_s22 = smov 5  }
   0x4   :  { %s4350_s17 = sld [smem:[%s4993_s0 + %s4280_s14]]   ;;  %s4283_s26 = smov 6  }
   0x5   :  { %s4355_s21 = sld [smem:[%s4993_s0 + %s4281_s18]]   ;;  %s4284_s30 = smov 7  }
   0x6   :  { %s4360_s25 = sld [smem:[%s4993_s0 + %s4282_s22]]   ;;  %s4285_s4 = smov 8  }
   0x7   :  { %s4365_s29 = sld [smem:[%s4993_s0 + %s4283_s26]]   ;;  %s4286_s10 = smov 9  }
   0x8   :  { %s4370_s3 = sld [smem:[%s4993_s0 + %s4284_s30]]   ;;  %s4287_s15 = smov 10  }
   0x9   :  { %5006 = sst [smem:[#allocation37_spill]] %s4345_s13  ;;  %s4288_s20 = smov 11  }
   0xa   :  { %5007 = sst [smem:[#allocation38_spill]] %s4350_s17  ;;  %s4289_s26 = smov 12  }
   0xb   :  { %s4375_s8 = sld [smem:[%s4993_s0 + %s4285_s4]]   ;;  %s4290_s1 = smov 13  }
   0xc   :  { %5008 = sst [smem:[#allocation39_spill]] %s4360_s25  ;;  %s4291_s7 = smov 14  }
   0xd   :  { %5009 = sst [smem:[#allocation40_spill]] %s4365_s29  ;;  %s4293_s22 = smov 16  }
   0xe   :  { %5010 = sst [smem:[#allocation41_spill]] %s4370_s3  ;;  %s4294_s28 = smov 17  }
   0xf   :  { %s4380_s14 = sld [smem:[%s4993_s0 + %s4286_s10]]  }
  0x10   :  { %s4385_s19 = sld [smem:[%s4993_s0 + %s4287_s15]]   ;;  %s4292_s15 = smov 15  }
  0x11   :  { %5011 = sst [smem:[#allocation42_spill]] %s4375_s8 }
  0x12   :  { %s4390_s24 = sld [smem:[%s4993_s0 + %s4288_s20]]  }
  0x13   :  { %s4395_s30 = sld [smem:[%s4993_s0 + %s4289_s26]]  }
  0x14   :  { %s4400_s6 = sld [smem:[%s4993_s0 + %s4290_s1]]  }
  0x15   :  { %5012 = sst [smem:[#allocation43_spill]] %s4380_s14 }
  0x16   :  { %5013 = sst [smem:[#allocation44_spill]] %s4385_s19 }
  0x17   :  { %s4405_s12 = sld [smem:[%s4993_s0 + %s4291_s7]]   ;;  %s4295_s7 = smov 18  }
  0x18   :  { %s4410_s20 = sld [smem:[%s4993_s0 + %s4292_s15]]   ;;  %s4296_s15 = smov 19  }
  0x19   :  { %5014 = sst [smem:[#allocation45_spill]] %s4395_s30 }
  0x1a   :  { %5015 = sst [smem:[#allocation46_spill]] %s4400_s6 }
  0x1b   :  { %s4415_s27 = sld [smem:[%s4993_s0 + %s4293_s22]]   ;;  %s4297_s22 = smov 20  }
  0x1c   :  { %s4420_s4 = sld [smem:[%s4993_s0 + %s4294_s28]]   ;;  %s4298_s28 = smov 21  }
  0x1d   :  { %5016 = sst [smem:[#allocation47_spill]] %s4405_s12 }
  0x1e   :  { %5017 = sst [smem:[#allocation48_spill]] %s4410_s20 }
  0x1f   :  { %s4425_s12 = sld [smem:[%s4993_s0 + %s4295_s7]]   ;;  %s4299_s7 = smov 22  }
  0x20   :  { %s4430_s6 = sld [smem:[%s4993_s0 + %s4296_s15]]   ;;  %s4300_s15 = smov 23  }
  0x21   :  { %5018 = sst [smem:[#allocation49_spill]] %s4415_s27 }
  0x22   :  { %5019 = sst [smem:[#allocation50_spill]] %s4420_s4 }
  0x23   :  { %s4435_s27 = sld [smem:[%s4993_s0 + %s4297_s22]]   ;;  %s4301_s22 = smov 24  }
  0x24   :  { %s4440_s30 = sld [smem:[%s4993_s0 + %s4298_s28]]   ;;  %s4302_s28 = smov 25  }
  0x25   :  { %5020 = sst [smem:[#allocation51_spill]] %s4425_s12 }
  0x26   :  { %5021 = sst [smem:[#allocation52_spill]] %s4430_s6 }
  0x27   :  { %s4445_s12 = sld [smem:[%s4993_s0 + %s4299_s7]]   ;;  %s4303_s7 = smov 26  }
  0x28   :  { %s4450_s17 = sld [smem:[%s4993_s0 + %s4300_s15]]   ;;  %s4304_s15 = smov 27  }
  0x29   :  { %5022 = sst [smem:[#allocation53_spill]] %s4435_s27 }
  0x2a   :  { %s4455_s27 = sld [smem:[%s4993_s0 + %s4301_s22]]   ;;  %s4305_s22 = smov 28  }
  0x2b   :  { %s4460_s19 = sld [smem:[%s4993_s0 + %s4302_s28]]   ;;  %s4306_s28 = smov 29  }
  0x2c   :  { %s4480_s29 = sld [smem:[%s4993_s0 + %s4306_s28]]  }
  0x2d   :  { %5023 = sst [smem:[#allocation54_spill]] %s4445_s12 }
  0x2e   :  { %5024 = sst [smem:[#allocation55_spill]] %s4450_s17 }
  0x2f   :  { %s4465_s12 = sld [smem:[%s4993_s0 + %s4303_s7]]   ;;  %s4307_s7 = smov 30  }
  0x30   :  { %5025 = sst [smem:[#allocation56_spill]] %s4455_s27 }
  0x31   :  { %5026 = sst [smem:[#allocation57_spill]] %s4460_s19 }
  0x32   :  { %s4470_s17 = sld [smem:[%s4993_s0 + %s4304_s15]]   ;;  %s4308_s15 = smov 31  }
  0x33   :  { %s4475_s27 = sld [smem:[%s4993_s0 + %s4305_s22]]  }
  0x34   :  { %5030 = sst [smem:[#allocation61_spill]] %s4480_s29 }
  0x35   :  { %5027 = sst [smem:[#allocation58_spill]] %s4465_s12 }
  0x36   :  { %s4485_s12 = sld [smem:[%s4993_s0 + %s4307_s7]]  }
  0x37   :  { %s4490_s8 = sld [smem:[%s4993_s0 + %s4308_s15]]  }
  0x38   :  { %5028 = sst [smem:[#allocation59_spill]] %s4470_s17 }
  0x39   :  { %5029 = sst [smem:[#allocation60_spill]] %s4475_s27 }
  0x3c   :  { %5031 = sst [smem:[#allocation62_spill]] %s4485_s12 }
  0x3d   :  { %5032 = sst [smem:[#allocation63_spill]] %s4490_s8 }
  0x3e   :  { %68 = vsyncpa [#allocation3], 0 }
  0x3f   :  { %70 = vsyncpa [#allocation3 + $0x1], 0 }
  0x40   :  { %71 = vsyncpa [#allocation6], 0 }
  0x41   :  { %73 = vsyncpa [#allocation6 + $0x1], 0 }
  0x42   :  { %74 = vsyncpa [#allocation9], 0 }
  0x43   :  { %76 = vsyncpa [#allocation9 + $0x1], 0 }
  0x44   :  { %77 = vsyncpa [#allocation12], 0 }
  0x45   :  { %78 = vsyncpa [#allocation15], 0 }
  0x46   :  { %79 = vsyncpa [#allocation18], 0 }
  0x47   :  { %80 = vsyncpa [#allocation21], 0 }
  0x48   :  { %81 = vsyncpa [#allocation24], 0 }
  0x49   :  { %82 = vsyncpa [#allocation4], 0 }
  0x4a   :  { %84 = vsyncpa [#allocation4 + $0x1], 0  ;;  %s4492_s22 = smov 0   ;;  %s4494_s23 = smov 0  }
  0x4b   :  { %s4496_s26 = smov 0   ;;  %s4498_s0 = smov 0  }
  0x4c LB: > { %s5033_s20 = sld [smem:[#allocation48_spill]]  ;;  %s4516_s1 = sadd.s32 4294967295, %s4276_s0   ;;  %s4264_s22 = sphi %s4492_s22, %s5074_s22   ;;  %s4276_s0 = sphi %s4498_s0, %s5077_s0   ;;  %s4272_s26 = sphi %s4496_s26, %s5076_s26   ;;  %s4268_s23 = sphi %s4494_s23, %s5075_s23  }
  0x4d   : > { %s5034_s19 = sld [smem:[#allocation57_spill]]  ;;  %p3033_p0 = scmp.ge.s32.totalorder %s4276_s0, 1 }
  0x4e   : > { %s5035_s17 = sld [smem:[#allocation59_spill]]  ;;  %p111_p1 = scmp.eq.s32.totalorder %s4516_s1, 0 }
  0x4f   : > { %s5036_s14 = sld [smem:[#allocation43_spill]]  ;;  %p792_p2 = scmp.lt.s32.totalorder %s4276_s0, 3 }
  0x50   : > { %s5037_s6 = sld [smem:[#allocation52_spill]]  ;;  %s4309_s7 = smov [#allocation7]  }
  0x51   : > { %s5038_s4 = sld [smem:[#allocation50_spill]]  ;;  %p4521_p3 = pnand %p3033_p0, %p792_p2 }
  0x52   : > { %s5039_s3 = sld [smem:[#allocation41_spill]]  ;;  %s806_s10 = sshll.u32 %s4309_s7, 4  ;;  %s807_s10 = int_to_ptr.vmem [resolvable:$true] %s806_s10 }
  0x53   : > { %s5040_s25 = sld [smem:[#allocation39_spill]]  ;;  %p3545_p5 = pneg %p4521_p3 }
  0x54   : > { %s5041_s13 = sld [smem:[#allocation37_spill]]  ;;  %s4310_s16 = smov [#allocation10]  }
  0x55   : > { %s5042_s2 = scalar_select %p4521_p3, 1, 0 }
  0x56   : > { %p4533_p6 = pnand %p3545_p5, %p111_p1  ;;  %s4537_s18 = sshll.u32 %s4310_s16, 4 }
  0x57   : > { %5043 = sst [smem:[#allocation64_spill]] %s5042_s2 }
  0x58   : > { %5045 = sst [smem:[#allocation65_spill]] %s4537_s18  ;;  %p4543_p8 = pneg %p4533_p6 }
  0x59   : > { %s815_s11 = sshll.u32 %s5040_s25, 4  ;;  %s4529_s11 = int_to_ptr.hbm [resolvable:$true] %s815_s11 }
  0x5a   : > { %s804_s28 = sshll.u32 %s5041_s13, 4  ;;  %s3761_s29 = scalar_lea.hbm %s5041_s13, 8  ;;  %s4513_s28 = int_to_ptr.hbm [resolvable:$true] %s804_s28 }
  0x5b   : > { %s3754_s7 = sshra.s32 %s4513_s28, 4  ;;  %s3755_s7 = int_to_ptr.hbm [resolvable:$true] %s3754_s7 }
  0x5c   : > { %s3756_s12 = scalar_lea.hbm %s3755_s7, 8  ;;  %p3762_p11 = scmp.lt.s32.totalorder %s3755_s7, %s5041_s13 }
  0x5d   : > { %p3757_p7 = scmp.ne.s32.totalorder %s3755_s7, %s3756_s12  ;;  %p3763_p12 = scmp.lt.s32.totalorder %s3761_s29, %s3756_s12 }
  0x5f   : > { %p3759_p9 = pnand %p4543_p8, %p3757_p7  ;;  %p3764_p13 = por %p3763_p12, %p3762_p11 }
  0x61   : > { %p3760_p10 = pneg %p3759_p9 }
  0x63   : > { %p3765_p0 = pnand %p3764_p13, %p3760_p10 }
  0x65   : > { %3768 = shalt.err (!%p3765_p0)
}
  0x66   : > { %3548 = dma.hbm_to_vmem [thread:$0]  (!%p4533_p6), %s4513_s28, 128, %s807_s10, [#allocation6]  }
  0x67   : > { %s3784_s16 = sshra.s32 %s4529_s11, 4  ;;  %s3791_s7 = scalar_lea.hbm %s5040_s25, 64  ;;  %s3785_s16 = int_to_ptr.hbm [resolvable:$true] %s3784_s16 }
  0x68   : > { %s3786_s18 = scalar_lea.hbm %s3785_s16, 64  ;;  %p3792_p9 = scmp.lt.s32.totalorder %s3785_s16, %s5040_s25 }
  0x69   : > { %p3787_p2 = scmp.ne.s32.totalorder %s3785_s16, %s3786_s18  ;;  %p3793_p11 = scmp.lt.s32.totalorder %s3791_s7, %s3786_s18 }
  0x6b   : > { %p3789_p5 = pnand %p3787_p2, %p4543_p8  ;;  %p3794_p10 = por %p3793_p11, %p3792_p9 }
  0x6d   : > { %p3790_p7 = pneg %p3789_p5 }
  0x6f   : > { %p3795_p12 = pnand %p3794_p10, %p3790_p7 }
  0x71   : > { %3798 = shalt.err (!%p3795_p12)
}
  0x72   : > { %s4311_s29 = smov 64   ;;  %s5047_s12 = sld [smem:[#allocation65_spill]] }
  0x73   : > { %s4312_s28 = smov 4   ;;  %s832_s18 = sshll.u32 %s5039_s3, 4  ;;  %s833_s18 = int_to_ptr.hbm [resolvable:$true] %s832_s18 }
  0x74   : > { %s4313_s16 = smov [#allocation11]   ;;  %s866_s13 = sshll.u32 %s4390_s24, 4  ;;  %s867_s13 = int_to_ptr.hbm [resolvable:$true] %s866_s13 }
  0x75   : > { %s834_s7 = sshll.u32 %s4313_s16, 4  ;;  %s3814_s25 = sshra.s32 %s833_s18, 4  ;;  %s835_s7 = int_to_ptr.vmem [resolvable:$true] %s834_s7  ;;  %s3815_s25 = int_to_ptr.hbm [resolvable:$true] %s3814_s25 }
  0x76   : > { %s3816_s27 = scalar_lea.hbm %s3815_s25, 64  ;;  %s3821_s2 = scalar_lea.hbm %s5039_s3, 64 }
  0x77   : > { %p3817_p13 = scmp.ne.s32.totalorder %s3815_s25, %s3816_s27  ;;  %p3822_p5 = scmp.lt.s32.totalorder %s3815_s25, %s5039_s3 }
  0x78   : > { %s5048_s10 = int_to_ptr.vmem [resolvable:$true] %s5047_s12  ;;  %p3823_p7 = scmp.lt.s32.totalorder %s3821_s2, %s3816_s27 }
  0x79   : > { %3551 = dma.hbm_to_vmem [thread:$0]  (!%p4533_p6), %s4529_s11, 1024, %s5048_s10, [#allocation9], %s4311_s29, %s4311_s29, %s4312_s28  }
  0x7a   : > { %p3819_p0 = pnand %p3817_p13, %p4543_p8  ;;  %p3824_p9 = por %p3823_p7, %p3822_p5 }
  0x7c   : > { %p3820_p2 = pneg %p3819_p0 }
  0x7e   : > { %p3825_p11 = pnand %p3824_p9, %p3820_p2 }
  0x80   : > { %3828 = shalt.err (!%p3825_p11)
}
  0x81   : > { %3554 = dma.hbm_to_vmem [thread:$0]  (!%p4533_p6), %s833_s18, 1024, %s835_s7, [#allocation12], %s4311_s29, %s4311_s29, %s4312_s28  }
  0x82   : > { %s4314_s11 = smov [#allocation14]   ;;  %s906_s10 = sshll.u32 %s5038_s4, 4  ;;  %s4579_s10 = int_to_ptr.hbm [resolvable:$true] %s906_s10 }
  0x83   : > { %s868_s12 = sshll.u32 %s4314_s11, 4  ;;  %s3844_s25 = sshra.s32 %s867_s13, 4  ;;  %s869_s12 = int_to_ptr.vmem [resolvable:$true] %s868_s12  ;;  %s3845_s25 = int_to_ptr.hbm [resolvable:$true] %s3844_s25 }
  0x84   : > { %s3846_s27 = scalar_lea.hbm %s3845_s25, 64  ;;  %s3851_s2 = scalar_lea.hbm %s4390_s24, 64 }
  0x85   : > { %p3847_p10 = scmp.ne.s32.totalorder %s3845_s25, %s3846_s27  ;;  %p3852_p0 = scmp.lt.s32.totalorder %s3845_s25, %s4390_s24 }
  0x86   : > { %p3853_p2 = scmp.lt.s32.totalorder %s3851_s2, %s3846_s27 }
  0x87   : > { %p3849_p12 = pnand %p3847_p10, %p4543_p8 }
  0x88   : > { %p3854_p5 = por %p3853_p2, %p3852_p0 }
  0x89   : > { %p3850_p13 = pneg %p3849_p12 }
  0x8b   : > { %p3855_p7 = pnand %p3854_p5, %p3850_p13 }
  0x8d   : > { %3858 = shalt.err (!%p3855_p7)
}
  0x8e   : > { %3560 = dma.hbm_to_vmem [thread:$0]  (!%p4533_p6), %s867_s13, 1024, %s869_s12, [#allocation15], %s4311_s29, %s4311_s29, %s4312_s28  }
  0x8f   : > { %s940_s18 = sshll.u32 %s4440_s30, 4  ;;  %s4315_s16 = smov [#allocation17]   ;;  %s4591_s18 = int_to_ptr.hbm [resolvable:$true] %s940_s18 }
  0x90   : > { %s908_s7 = sshll.u32 %s4315_s16, 4  ;;  %s3874_s11 = sshra.s32 %s4579_s10, 4  ;;  %s909_s7 = int_to_ptr.vmem [resolvable:$true] %s908_s7  ;;  %s3875_s11 = int_to_ptr.hbm [resolvable:$true] %s3874_s11 }
  0x91   : > { %s3876_s25 = scalar_lea.hbm %s3875_s11, 64  ;;  %s3881_s27 = scalar_lea.hbm %s5038_s4, 64 }
  0x92   : > { %p3877_p9 = scmp.ne.s32.totalorder %s3875_s11, %s3876_s25  ;;  %p3882_p12 = scmp.lt.s32.totalorder %s3875_s11, %s5038_s4 }
  0x93   : > { %p3883_p13 = scmp.lt.s32.totalorder %s3881_s27, %s3876_s25 }
  0x94   : > { %p3879_p11 = pnand %p3877_p9, %p4543_p8 }
  0x95   : > { %p3884_p0 = por %p3883_p13, %p3882_p12 }
  0x96   : > { %p3880_p10 = pneg %p3879_p11 }
  0x98   : > { %p3885_p2 = pnand %p3884_p0, %p3880_p10 }
  0x9a   : > { %3888 = shalt.err (!%p3885_p2)
}
  0x9b   : > { %3566 = dma.hbm_to_vmem [thread:$0]  (!%p4533_p6), %s4579_s10, 1024, %s909_s7, [#allocation18], %s4311_s29, %s4311_s29, %s4312_s28  }
  0x9c   : > { %s4316_s13 = smov [#allocation20]   ;;  %s849_s2 = sshll.u32 %s5036_s14, 4  ;;  %s4605_s2 = int_to_ptr.hbm [resolvable:$true] %s849_s2 }
  0x9d   : > { %s942_s12 = sshll.u32 %s4316_s13, 4  ;;  %s3904_s16 = sshra.s32 %s4591_s18, 4  ;;  %s943_s12 = int_to_ptr.vmem [resolvable:$true] %s942_s12  ;;  %s3905_s16 = int_to_ptr.hbm [resolvable:$true] %s3904_s16 }
  0x9e   : > { %s3906_s11 = scalar_lea.hbm %s3905_s16, 64  ;;  %s3911_s25 = scalar_lea.hbm %s4440_s30, 64 }
  0x9f   : > { %p3907_p5 = scmp.ne.s32.totalorder %s3905_s16, %s3906_s11  ;;  %p3912_p11 = scmp.lt.s32.totalorder %s3905_s16, %s4440_s30 }
  0xa0   : > { %p3913_p10 = scmp.lt.s32.totalorder %s3911_s25, %s3906_s11 }
  0xa1   : > { %p3909_p7 = pnand %p3907_p5, %p4543_p8 }
  0xa2   : > { %p3914_p12 = por %p3913_p10, %p3912_p11 }
  0xa3   : > { %p3910_p9 = pneg %p3909_p7 }
  0xa5   : > { %p3915_p13 = pnand %p3914_p12, %p3910_p9 }
  0xa7   : > { %3918 = shalt.err (!%p3915_p13)
}
  0xa8   : > { %3572 = dma.hbm_to_vmem [thread:$0]  (!%p4533_p6), %s4591_s18, 1024, %s943_s12, [#allocation21], %s4311_s29, %s4311_s29, %s4312_s28  }
  0xa9   : > { %s889_s10 = sshll.u32 %s5033_s20, 4  ;;  %s4317_s7 = smov [#allocation13]   ;;  %s4619_s10 = int_to_ptr.hbm [resolvable:$true] %s889_s10 }
  0xaa   : > { %s851_s27 = sshll.u32 %s4317_s7, 4  ;;  %s3934_s13 = sshra.s32 %s4605_s2, 4  ;;  %s852_s27 = int_to_ptr.vmem [resolvable:$true] %s851_s27  ;;  %s3935_s13 = int_to_ptr.hbm [resolvable:$true] %s3934_s13 }
  0xab   : > { %s3936_s16 = scalar_lea.hbm %s3935_s13, 64  ;;  %s3941_s11 = scalar_lea.hbm %s5036_s14, 64 }
  0xac   : > { %p3937_p0 = scmp.ne.s32.totalorder %s3935_s13, %s3936_s16  ;;  %p3942_p7 = scmp.lt.s32.totalorder %s3935_s13, %s5036_s14 }
  0xad   : > { %p3943_p9 = scmp.lt.s32.totalorder %s3941_s11, %s3936_s16 }
  0xae   : > { %p3939_p2 = pnand %p3937_p0, %p4543_p8 }
  0xaf   : > { %p3944_p11 = por %p3943_p9, %p3942_p7 }
  0xb0   : > { %p3940_p5 = pneg %p3939_p2 }
  0xb2   : > { %p3945_p10 = pnand %p3944_p11, %p3940_p5 }
  0xb4   : > { %3948 = shalt.err (!%p3945_p10)
}
  0xb5   : > { %3557 = dma.hbm_to_vmem [thread:$0]  (!%p4533_p6), %s4605_s2, 1024, %s852_s27, [#allocation12], %s4311_s29, %s4311_s29, %s4312_s28  }
  0xb6   : > { %s4318_s18 = smov [#allocation16]   ;;  %s923_s25 = sshll.u32 %s5037_s6, 4  ;;  %s4633_s25 = int_to_ptr.hbm [resolvable:$true] %s923_s25 }
  0xb7   : > { %s891_s12 = sshll.u32 %s4318_s18, 4  ;;  %s3964_s7 = sshra.s32 %s4619_s10, 4  ;;  %s892_s12 = int_to_ptr.vmem [resolvable:$true] %s891_s12  ;;  %s3965_s7 = int_to_ptr.hbm [resolvable:$true] %s3964_s7 }
  0xb8   : > { %s3966_s13 = scalar_lea.hbm %s3965_s7, 64  ;;  %s3971_s16 = scalar_lea.hbm %s5033_s20, 64 }
  0xb9   : > { %p3967_p12 = scmp.ne.s32.totalorder %s3965_s7, %s3966_s13  ;;  %p3972_p2 = scmp.lt.s32.totalorder %s3965_s7, %s5033_s20 }
  0xba   : > { %p3973_p5 = scmp.lt.s32.totalorder %s3971_s16, %s3966_s13 }
  0xbb   : > { %p3969_p13 = pnand %p3967_p12, %p4543_p8 }
  0xbc   : > { %p3974_p7 = por %p3973_p5, %p3972_p2 }
  0xbd   : > { %p3970_p0 = pneg %p3969_p13 }
  0xbf   : > { %p3975_p9 = pnand %p3974_p7, %p3970_p0 }
  0xc1   : > { %3978 = shalt.err (!%p3975_p9)
}
  0xc2   : > { %3563 = dma.hbm_to_vmem [thread:$0]  (!%p4533_p6), %s4619_s10, 1024, %s892_s12, [#allocation15], %s4311_s29, %s4311_s29, %s4312_s28  }
  0xc3   : > { %s963_s2 = sshll.u32 %s5034_s19, 4  ;;  %s4319_s27 = smov [#allocation19]   ;;  %s4647_s2 = int_to_ptr.hbm [resolvable:$true] %s963_s2 }
  0xc4   : > { %s925_s11 = sshll.u32 %s4319_s27, 4  ;;  %s3994_s18 = sshra.s32 %s4633_s25, 4  ;;  %s926_s11 = int_to_ptr.vmem [resolvable:$true] %s925_s11  ;;  %s3995_s18 = int_to_ptr.hbm [resolvable:$true] %s3994_s18 }
  0xc5   : > { %s3996_s7 = scalar_lea.hbm %s3995_s18, 64  ;;  %s4001_s13 = scalar_lea.hbm %s5037_s6, 64 }
  0xc6   : > { %p3997_p11 = scmp.ne.s32.totalorder %s3995_s18, %s3996_s7  ;;  %p4002_p13 = scmp.lt.s32.totalorder %s3995_s18, %s5037_s6 }
  0xc7   : > { %p4003_p0 = scmp.lt.s32.totalorder %s4001_s13, %s3996_s7 }
  0xc8   : > { %p3999_p10 = pnand %p3997_p11, %p4543_p8 }
  0xc9   : > { %p4004_p2 = por %p4003_p0, %p4002_p13 }
  0xca   : > { %p4000_p12 = pneg %p3999_p10 }
  0xcc   : > { %p4005_p5 = pnand %p4004_p2, %p4000_p12 }
  0xce   : > { %4008 = shalt.err (!%p4005_p5)
}
  0xcf   : > { %3569 = dma.hbm_to_vmem [thread:$0]  (!%p4533_p6), %s4633_s25, 1024, %s926_s11, [#allocation18], %s4311_s29, %s4311_s29, %s4312_s28  }
  0xd0   : > { %s4320_s10 = smov [#allocation22]   ;;  %s980_s16 = sshll.u32 %s5035_s17, 4  ;;  %s4661_s16 = int_to_ptr.hbm [resolvable:$true] %s980_s16 }
  0xd1   : > { %s965_s12 = sshll.u32 %s4320_s10, 4  ;;  %s4024_s27 = sshra.s32 %s4647_s2, 4  ;;  %s966_s12 = int_to_ptr.vmem [resolvable:$true] %s965_s12  ;;  %s4025_s27 = int_to_ptr.hbm [resolvable:$true] %s4024_s27 }
  0xd2   : > { %s4026_s18 = scalar_lea.hbm %s4025_s27, 64  ;;  %s4031_s7 = scalar_lea.hbm %s5034_s19, 64 }
  0xd3   : > { %p4027_p7 = scmp.ne.s32.totalorder %s4025_s27, %s4026_s18  ;;  %p4032_p10 = scmp.lt.s32.totalorder %s4025_s27, %s5034_s19 }
  0xd4   : > { %p4033_p12 = scmp.lt.s32.totalorder %s4031_s7, %s4026_s18 }
  0xd5   : > { %p4029_p9 = pnand %p4027_p7, %p4543_p8 }
  0xd6   : > { %p4034_p13 = por %p4033_p12, %p4032_p10 }
  0xd7   : > { %p4030_p11 = pneg %p4029_p9 }
  0xd9   : > { %p4035_p0 = pnand %p4034_p13, %p4030_p11 }
  0xdb   : > { %4038 = shalt.err (!%p4035_p0)
}
  0xdc   : > { %3575 = dma.hbm_to_vmem [thread:$0]  (!%p4533_p6), %s4647_s2, 1024, %s966_s12, [#allocation21], %s4311_s29, %s4311_s29, %s4312_s28  }
  0xdd   : > { %s4321_s25 = smov [#allocation23]   ;;  %s4054_s13 = sshra.s32 %s4661_s16, 4  ;;  %s4055_s13 = int_to_ptr.hbm [resolvable:$true] %s4054_s13 }
  0xde   : > { %s982_s11 = sshll.u32 %s4321_s25, 4  ;;  %s4056_s10 = scalar_lea.hbm %s4055_s13, 64  ;;  %s983_s11 = int_to_ptr.vmem [resolvable:$true] %s982_s11 }
  0xdf   : > { %p4057_p2 = scmp.ne.s32.totalorder %s4055_s13, %s4056_s10  ;;  %s4061_s27 = scalar_lea.hbm %s5035_s17, 64 }
  0xe0   : > { %p4062_p9 = scmp.lt.s32.totalorder %s4055_s13, %s5035_s17  ;;  %p4063_p11 = scmp.lt.s32.totalorder %s4061_s27, %s4056_s10 }
  0xe1   : > { %p4059_p5 = pnand %p4057_p2, %p4543_p8 }
  0xe2   : > { %p4064_p10 = por %p4063_p11, %p4062_p9 }
  0xe3   : > { %p4060_p7 = pneg %p4059_p5 }
  0xe5   : > { %p4065_p12 = pnand %p4064_p10, %p4060_p7 }
  0xe7   : > { %4068 = shalt.err (!%p4065_p12)
}
  0xe8   : > { %3578 = dma.hbm_to_vmem [thread:$0]  (!%p4533_p6), %s4661_s16, 1024, %s983_s11, [#allocation24], %s4311_s29, %s4311_s29, %s4312_s28  }
  0xe9   : > { %s3032_s8 = sadd.s32 4294967294, %s4276_s0   ;;  %s4687_s15 = sadd.s32 1, %s4276_s0  }
  0xea   : > { %s97_s2 = sadd.s32 1, %s4272_s26  ;;  %s94_s12 = ssub.s32 %s4276_s0, %s4687_s15 }
  0xeb   : > { %p104_p8 = scmp.ne.s32.totalorder %s4272_s26, %s4268_s23  ;;  %p95_p13 = scmp.eq.s32.totalorder %s94_s12, 0 }
  0xec   : > { %p105_p0 = scmp.eq.s32.totalorder %s4276_s0, 0  ;;  %p110_p2 = scmp.ne.s32.totalorder %s4268_s23, %s4264_s22 }
  0xed   : > { %p779_p5 = scmp.eq.s32.totalorder %s4516_s1, 1  ;;  %p785_p11 = scmp.eq.s32.totalorder %s3032_s8, 1 }
  0xee   : > { %s4699_s18 = scalar_select %p95_p13, %s4272_s26, %s97_s2  }
  0xef   : > { %p4701_p7 = por %p105_p0, %p104_p8  ;;  %p4707_p6 = por %p111_p1, %p110_p2 }
  0xf0   : > { %p4711_p9 = por %p779_p5, %p104_p8  ;;  %p3604_p10 = scmp.lt.s32.totalorder %s4276_s0, 2 }
  0xf1   : > { %s4717_s16 = sand.u32 1, %s4272_s26   ;;  %p4719_p12 = por %p785_p11, %p110_p2 }
  0xf2   : > { %s3046_s11 = sshll.u32 %s4717_s16, 3  ;;  %s3047_s13 = sshll.u32 %s4276_s0, 3 }
  0xf3   : > { %s1013_s10 = scalar_lea.hbm %s4335_s5, %s3047_s13  ;;  %s1009_s2 = scalar_lea.vmem [#allocation2], %s3046_s11 }
  0xf4   : > { %s1015_s27 = sshll.u32 %s1013_s10, 4  ;;  %s1017_s12 = sshll.u32 %s1009_s2, 4  ;;  %s1016_s27 = int_to_ptr.hbm [resolvable:$true] %s1015_s27  ;;  %s1018_s12 = int_to_ptr.vmem [resolvable:$true] %s1017_s12 }
  0xf5   : > { %p4728_p8 = pnand %p3604_p10, %p4701_p7  ;;  %s1032_s3 = scalar_lea.hbm %s4340_s9, %s3047_s13 }
  0xf6   : > { %s1024_s4 = sand.u32 1, %s4276_s0   ;;  %s1006_s6 = scalar_lea.sflag [#allocation3], %s4717_s16 }
  0xf7   : > { %s4084_s14 = sshra.s32 %s1016_s27, 4  ;;  %p4088_p0 = pneg %p4728_p8  ;;  %s4085_s14 = int_to_ptr.hbm [resolvable:$true] %s4084_s14 }
  0xf8   : > { %s4086_s17 = scalar_lea.hbm %s4085_s14, 8  ;;  %s4091_s7 = scalar_lea.hbm %s4335_s5, 16 }
  0xf9   : > { %p4087_p13 = scmp.ne.s32.totalorder %s4085_s14, %s4086_s17  ;;  %p4092_p7 = scmp.lt.s32.totalorder %s4085_s14, %s4335_s5 }
  0xfa   : > { %p4093_p11 = scmp.lt.s32.totalorder %s4091_s7, %s4086_s17 }
  0xfb   : > { %p4089_p2 = pnand %p4088_p0, %p4087_p13 }
  0xfc   : > { %p4094_p10 = por %p4093_p11, %p4092_p7 }
  0xfd   : > { %p4090_p5 = pneg %p4089_p2 }
  0xff   : > { %p4095_p4 = pnand %p4094_p10, %p4090_p5 }
 0x101   : > { %4098 = shalt.err (!%p4095_p4)
}
 0x102   : > { %3582 = dma.hbm_to_vmem [thread:$0]  (!%p4728_p8), %s1016_s27, 128, %s1018_s12, %s1006_s6  }
 0x103   : > { %s1034_s13 = sshll.u32 %s1032_s3, 4  ;;  %s1028_s10 = scalar_lea.vmem [#allocation5], %s3046_s11  ;;  %s1035_s13 = int_to_ptr.hbm [resolvable:$true] %s1034_s13 }
 0x104   : > { %s1036_s2 = sshll.u32 %s1028_s10, 4  ;;  %s1025_s19 = scalar_lea.sflag [#allocation6], %s1024_s4  ;;  %s1037_s2 = int_to_ptr.vmem [resolvable:$true] %s1036_s2 }
 0x105   : > { %s4114_s20 = sshra.s32 %s1035_s13, 4  ;;  %s4121_s14 = scalar_lea.hbm %s4340_s9, 16  ;;  %s4115_s20 = int_to_ptr.hbm [resolvable:$true] %s4114_s20 }
 0x106   : > { %s4116_s17 = scalar_lea.hbm %s4115_s20, 8  ;;  %p4122_p5 = scmp.lt.s32.totalorder %s4115_s20, %s4340_s9 }
 0x107   : > { %p4117_p13 = scmp.ne.s32.totalorder %s4115_s20, %s4116_s17  ;;  %p4123_p7 = scmp.lt.s32.totalorder %s4121_s14, %s4116_s17 }
 0x109   : > { %p4119_p4 = pnand %p4117_p13, %p4088_p0  ;;  %p4124_p11 = por %p4123_p7, %p4122_p5 }
 0x10b   : > { %p4120_p2 = pneg %p4119_p4 }
 0x10d   : > { %p4125_p10 = pnand %p4124_p11, %p4120_p2 }
 0x10f   : > { %4128 = shalt.err (!%p4125_p10)
}
 0x110   : > { %3585 = dma.hbm_to_vmem [thread:$0]  (!%p4728_p8), %s1035_s13, 128, %s1037_s2, %s1025_s19  }
 0x111   : > { %s1055_s3 = scalar_lea.hbm %s4355_s21, %s4276_s0  ;;  %s1052_s6 = scalar_lea.vmem [#allocation8], %s4717_s16 }
 0x112   : > { %s1059_s11 = sshll.u32 %s1052_s6, 4  ;;  %s1057_s27 = sshll.u32 %s1055_s3, 4  ;;  %s1060_s11 = int_to_ptr.vmem [resolvable:$true] %s1059_s11  ;;  %s1058_s27 = int_to_ptr.hbm [resolvable:$true] %s1057_s27 }
 0x113   : > { %s1050_s20 = scalar_lea.sflag [#allocation9], %s1024_s4  ;;  %s4144_s12 = sshra.s32 %s1058_s27, 4  ;;  %s4145_s12 = int_to_ptr.hbm [resolvable:$true] %s4144_s12 }
 0x114   : > { %s4146_s7 = scalar_lea.hbm %s4145_s12, 1  ;;  %s4151_s10 = scalar_lea.hbm %s4355_s21, 2 }
 0x115   : > { %p4147_p13 = scmp.ne.s32.totalorder %s4145_s12, %s4146_s7  ;;  %p4152_p5 = scmp.lt.s32.totalorder %s4145_s12, %s4355_s21 }
 0x116   : > { %p4153_p7 = scmp.lt.s32.totalorder %s4151_s10, %s4146_s7 }
 0x117   : > { %p4149_p4 = pnand %p4147_p13, %p4088_p0 }
 0x118   : > { %p4154_p11 = por %p4153_p7, %p4152_p5 }
 0x119   : > { %p4150_p2 = pneg %p4149_p4 }
 0x11b   : > { %p4155_p10 = pnand %p4154_p11, %p4150_p2 }
 0x11d   : > { %4158 = shalt.err (!%p4155_p10)
}
 0x11e   : > { %3588 = dma.hbm_to_vmem [thread:$0]  (!%p4728_p8), %s1058_s27, 16, %s1060_s11, %s1050_s20  }
 0x11f   : > { %1068 = sbr.rel (%p4521_p3) target bundleno = 4095 (0xfff), region = 144  ;;  %s4768_s4 = sand.u32 (!%p4521_p3), 1, %s4268_s23  }
 0x120   : > { %s4771_s16 = sshll.u32 (!%p4521_p3), %s4768_s4, 3  ;;  %s1071_s13 = scalar_lea.sflag (!%p4521_p3), [#allocation3], %s4768_s4 }
 0x121   : > { %s1074_s2 = scalar_lea.vmem (!%p4521_p3), [#allocation2], %s4771_s16 }
 0x124   : > { %4219 = dma.done.wait (%p4707_p6), %s1071_s13, 128  }
 0x125   : > { %4221 = vsyncadd (%p4707_p6), %s1071_s13, 4294967168  ;;  %s1080_s8 = sand.u32 1, %s4516_s1   ;;  %s1084_s14 = scalar_lea.vmem [#allocation5], %s4771_s16 }
 0x126   : > { %s1081_s17 = scalar_lea.sflag [#allocation6], %s1080_s8 }
 0x127   : > { %4223 = dma.done.wait (%p4707_p6), %s1081_s17, 128  }
 0x128   : > { %4225 = vsyncadd (%p4707_p6), %s1081_s17, 4294967168 }
 0x129   : > { %4227 = dma.done.wait (%p111_p1), [#allocation6], 128  }
 0x12a   : > { %4229 = vsyncadd (%p111_p1), [#allocation6], 4294967168  ;;  %s1096_s3 = scalar_lea.sflag [#allocation9], %s1080_s8  ;;  %s1098_s6 = scalar_lea.vmem [#allocation8], %s4768_s4 }
 0x12b   : > { %4231 = dma.done.wait (%p4707_p6), %s1096_s3, 16  }
 0x12c   : > { %4233 = vsyncadd (%p4707_p6), %s1096_s3, 4294967280 }
 0x12d   : > { %4235 = dma.done.wait (%p111_p1), [#allocation9], 1024  }
 0x12e   : > { %4237 = vsyncadd (%p111_p1), [#allocation9], 4294966272 }
 0x12f   : > { %4239 = dma.done.wait (%p111_p1), [#allocation12], 2048  }
 0x130   : > { %4241 = vsyncadd (%p111_p1), [#allocation12], 4294965248 }
 0x131   : > { %4243 = dma.done.wait (%p111_p1), [#allocation15], 2048  }
 0x132   : > { %4245 = vsyncadd (%p111_p1), [#allocation15], 4294965248 }
 0x133   : > { %4247 = dma.done.wait (%p111_p1), [#allocation18], 2048  }
 0x134   : > { %4249 = vsyncadd (%p111_p1), [#allocation18], 4294965248 }
 0x135   : > { %4251 = dma.done.wait (%p111_p1), [#allocation21], 2048  }
 0x136   : > { %4253 = vsyncadd (%p111_p1), [#allocation21], 4294965248 }
 0x137   : > { %4255 = dma.done.wait (%p111_p1), [#allocation24], 1024  }
 0x138   : > { %4257 = vsyncadd (%p111_p1), [#allocation24], 4294966272  ;;  %v3420_v0 = vld [vmem:[#allocation10 + $0x38] sm:$0xff]  ;;  %v3419_v2 = vld [vmem:[#allocation10 + $0x30] sm:$0xff]  ;;  %s5055_s29 = sld [smem:[#allocation42_spill]]  ;;  %vm1517_vm0 = vcmask 261120  }
 0x139   : > { %v3428_v1 = vld [vmem:[#allocation11 + $0x38] sm:$0xff]  ;;  %1373 = vmatpush.bf16.msra.mxu0 %v3420_v0  ;;  %v3427_v3 = vld [vmem:[#allocation11 + $0x30] sm:$0xff]  ;;  %v3418_v5 = vld [vmem:[#allocation10 + $0x28] sm:$0xff]  ;;  %s5056_s11 = sld [smem:[#allocation40_spill]]  ;;  %s4322_s27 = smov 32   ;;  %vm1555_vm1 = vcmask 1043456  }
 0x13a   : > { %1437 = vmatpush.bf16.msra.mxu1 %v3428_v1  ;;  %v3436_v4 = vld [vmem:[#allocation13 + $0x38] sm:$0xff]  ;;  %v3426_v6 = vld [vmem:[#allocation11 + $0x28] sm:$0xff]  ;;  %v3435_v7 = vld [vmem:[#allocation13 + $0x30] sm:$0xff]  ;;  %s4323_s20 = smov 96   ;;  %s5057_s12 = sld [smem:[#allocation44_spill]]  ;;  %v4325_v50 = vmov 0.0  }
 0x13b   : > { %1501 = vmatpush.bf16.msra.mxu2 %v3436_v4  ;;  %v3417_v8 = vld [vmem:[#allocation10 + $0x20] sm:$0xff]  ;;  %v3434_v10 = vld [vmem:[#allocation13 + $0x28] sm:$0xff]  ;;  %v3416_v11 = vld [vmem:[#allocation10 + $0x18] sm:$0xff]  ;;  %s4324_s7 = smov 64   ;;  %s5058_s10 = sld [smem:[#allocation38_spill]]  ;;  %vm1539_vm3 = vcmask 64512  }
 0x13c   : > { %v3425_v9 = vld [vmem:[#allocation11 + $0x20] sm:$0xff]  ;;  %v3424_v12 = vld [vmem:[#allocation11 + $0x18] sm:$0xff]  ;;  %v3415_v14 = vld [vmem:[#allocation10 + $0x10] sm:$0xff]  ;;  %p1240_p1 = scmp.lt.s32.totalorder %s4516_s1, 1  ;;  %s5060_s8 = sld [smem:[#allocation46_spill]] }
 0x13d   : > { %1374 = vmatpush.bf16.msra.mxu0 %v3419_v2  ;;  %v3433_v13 = vld [vmem:[#allocation13 + $0x20] sm:$0xff]  ;;  %v3423_v15 = vld [vmem:[#allocation11 + $0x10] sm:$0xff]  ;;  %v3432_v16 = vld [vmem:[#allocation13 + $0x18] sm:$0xff]  ;;  %s5061_s17 = sld [smem:[#allocation47_spill]] }
 0x13e   : > { %1438 = vmatpush.bf16.msra.mxu1 %v3427_v3  ;;  %v3414_v17 = vld [vmem:[#allocation10 + $0x8] sm:$0xff]  ;;  %v3431_v19 = vld [vmem:[#allocation13 + $0x10] sm:$0xff]  ;;  %v3413_v20 = vld [vmem:[#allocation10] sm:$0xff]  ;;  %s1241_s19 = scalar_select %p1240_p1, %s4516_s1, 1 }
 0x13f   : > { %1502 = vmatpush.bf16.msra.mxu2 %v3435_v7  ;;  %v3422_v18 = vld [vmem:[#allocation11 + $0x8] sm:$0xff]  ;;  %v3421_v21 = vld [vmem:[#allocation11] sm:$0xff]  ;;  %v3699_v26 = vld [vmem:[%s5055_s29] ss:$0 sm:$0xff]  ;;  %s5063_s3 = sld [smem:[#allocation49_spill]] }
 0x140   : > { %v4820_v22 = vld [vmem:[%s1074_s2] sm:$0xff]  ;;  %v3430_v23 = vld [vmem:[#allocation13 + $0x8] sm:$0xff]  ;;  %s5059_s2 = sld [smem:[#allocation45_spill]] }
 0x141   : > { %1375 = vmatpush.bf16.msra.mxu0 %v3418_v5  ;;  %v1321_v24 = vpack.c.bf16 %v4820_v22, %v4820_v22  ;;  %v3429_v25 = vld [vmem:[#allocation13] sm:$0xff]  ;;  %v3698_v29 = vld [vmem:[%s5056_s11] ss:$0 sm:$0xff]  ;;  %v3438_v32 = vld [vmem:[#allocation14 + $0x8] sm:$0xff]  ;;  %s1242_s13 = scalar_lea.vmem %s5058_s10, %s1241_s19  ;;  %s5065_s29 = sld [smem:[#allocation54_spill]] }
 0x142   : > { %1439 = vmatpush.bf16.msra.mxu1 %v3426_v6  ;;  %v3437_v38 = vld [vmem:[#allocation14] sm:$0xff]  ;;  %v3700_v40 = vld [vmem:[%s5057_s12] ss:$0 sm:$0xff]  ;;  %s5066_s11 = sld [smem:[#allocation55_spill]] }
 0x143   : > { %1503 = vmatpush.bf16.msra.mxu2 %v3434_v10  ;;  %v1246_v49 = vld [vmem:[%s1242_s13] sm:$0x1]  ;;  %s5069_s12 = sld [smem:[#allocation60_spill]]  ;;  %s3410_s13 = sshll.u32 %s4516_s1, 3 }
 0x144   : > { %vm1247_vm2 = vcmp.ne.s32.totalorder %v1246_v49, 0  ;;  %v1245_v53 = vld [vmem:[#allocation7] sm:$0xff]  ;;  %s5071_s10 = sld [smem:[#allocation63_spill]]  ;;  %s2761_s1 = scalar_lea.sflag [#allocation4], %s4768_s4 }
 0x145   : > { %1376 = vmatpush.bf16.msra.mxu0 %v3417_v8  ;;  %v1248_v51 = vsel %vm1247_vm2, -1e+09, %v4325_v50  ;;  %s5072_s19 = sld [smem:[#allocation62_spill]] }
 0x146   : > { %1440 = vmatpush.bf16.msra.mxu1 %v3425_v9  ;;  %v1250_v52 = vperm.slane %v1248_v51, 0 }
 0x147   : > { %1504 = vmatpush.bf16.msra.mxu2 %v3433_v13 }
 0x148   : > { %v1252_v54 = vadd.f32 %v1250_v52, %v1245_v53 }
 0x149   : > { %1377 = vmatpush.bf16.msra.mxu0 %v3416_v11 }
 0x14a   : > { %1441 = vmatpush.bf16.msra.mxu1 %v3424_v12 }
 0x14b   : > { %1505 = vmatpush.bf16.msra.mxu2 %v3432_v16 }
 0x14d   : > { %1378 = vmatpush.bf16.msra.mxu0 %v3415_v14 }
 0x14e   : > { %1442 = vmatpush.bf16.msra.mxu1 %v3423_v15 }
 0x14f   : > { %1506 = vmatpush.bf16.msra.mxu2 %v3431_v19 }
 0x151   : > { %1379 = vmatpush.bf16.msra.mxu0 %v3414_v17 }
 0x152   : > { %1443 = vmatpush.bf16.msra.mxu1 %v3422_v18 }
 0x153   : > { %1507 = vmatpush.bf16.msra.mxu2 %v3430_v23 }
 0x155   : > { %1380 = vmatpush.bf16.msra.mxu0 %v3413_v20 }
 0x156   : > { %1444 = vmatpush.bf16.msra.mxu1 %v3421_v21 }
 0x157   : > { %1508 = vmatpush.bf16.msra.mxu2 %v3429_v25 }
 0x158   : > { %1381 = vmatmul.bf16.vlgmr.msra.gmra.mxu0 %v1321_v24 }
 0x159   : > { %1445 = vmatmul.bf16.vlgmr.msra.gmra.mxu1 %v1321_v24 }
 0x15a   : > { %1509 = vmatmul.bf16.vlgmr.msra.gmra.mxu2 %v1321_v24 }
 0x1d5   : > { %v1382_v27 = vpop.f32.mrf.mxu0 }
 0x1d6   : > { %v1446_v28 = vpop.f32.mrf.mxu1  ;;  %v1383_v33 = vadd.f32 %v3698_v29, %v1382_v27 }
 0x1d7   : > { %v1447_v30 = vadd.f32 %v3699_v26, %v1446_v28 }
 0x1d8   : > { %v1514_v37 = vpack.c.bf16 %v1383_v33, %v1383_v33 }
 0x1d9   : > { %v1515_v31 = vpack.c.bf16 %v1447_v30, %v1447_v30 }
 0x1db   : > { %1781 = vrot.lane.b32.xlu2 %v1515_v31, %s4322_s27  ;;  %1577 = vrot.lane.b32.xlu1 %v1515_v31, %s4323_s20  ;;  %v1522_v34 = vsel %vm1517_vm0, %v1515_v31, 0 }
 0x1dc   : > { %1531 = vmatpush.bf16.xpose.msrb.mxu2 %v1522_v34 }
 0x1dd   : > { %v1384_v35 = vpop.f32.mrf.mxu0  ;;  %v1510_v39 = vpop.f32.mrf.mxu2 }
 0x1de   : > { %v1448_v36 = vpop.f32.mrf.mxu1  ;;  %v1511_v41 = vadd.f32 %v3700_v40, %v1510_v39 }
 0x1e0   : > { %v4834_v43 = vpack.c.bf16 %v1511_v41, %v1511_v41 }
 0x1e2   : > { %v1557_v44 = vsel %vm1555_vm1, %v4834_v43, 0 }
 0x1e3   : > { %1693 = vrot.lane.b32.xlu2 %v1515_v31, %s4324_s7  ;;  %1574 = vrot.lane.b32.xlu1 %v1514_v37, %s4323_s20 }
 0x1e4   : > { %1684 = vmatpush.bf16.msra.mxu2 %v3438_v32  ;;  %1566 = vmatpush.bf16.msra.mxu3 %v1557_v44 }
 0x1e5   : > { %3161 = vmatmul.msk.bf16.vlgmr.msrb.gmra.mxu2 %vm1517_vm0, %v1514_v37  ;;  %v1512_v42 = vpop.f32.mrf.mxu2 }
 0x1e8   : > { %1685 = vmatpush.bf16.msra.mxu2 %v3437_v38 }
 0x1eb   : > { %1691 = vrot.lane.b32.xlu1 %v1514_v37, %s4324_s7 }
 0x235   : > { %v1782_v45 = vpop.permute.xlu2 %1781 }
 0x236   : > { %v1787_v46 = vsel %vm1517_vm0, %v1782_v45, 0 }
 0x237   : > { %1796 = vmatpush.bf16.xpose.msrb.mxu2 %v1787_v46 }
 0x23d   : > { %v1694_v4 = vpop.permute.xlu2 %1693 }
 0x23e   : > { %v1699_v6 = vsel %vm1517_vm0, %v1694_v4, 0 }
 0x24d   : > { %v1578_v47 = vpop.permute.xlu1 %1577 }
 0x24e   : > { %v1583_v48 = vsel %vm1517_vm0, %v1578_v47, 0 }
 0x24f   : > { %1592 = vmatpush.bf16.xpose.msrb.mxu3 %v1583_v48 }
 0x255   : > { %v1575_v7 = vpop.permute.xlu1 %1574 }
 0x25d   : > { %v1692_v8 = vpop.permute.xlu1 %1691 }
 0x268   : > { %v1533_v55 = vpop.f32.mrf.mxu2 }
 0x269   : > { %v1537_v56 = vmul.f32 0.17677669, %v1533_v55 }
 0x26b   : > { %v1538_v57 = vadd.f32 %v1537_v56, %v1252_v54 }
 0x26d   : > { %v1540_v58 = vsel %vm1539_vm3, %v1538_v57, -inf }
 0x26e   : > { %1541 = vmax.xlane.f32.xlu0 %v1540_v58 }
 0x270   : > { %v1535_v59 = vpop.f32.mrf.mxu2 }
 0x2e1   : > { %v1542_v60 = vpop.xlane.xlu0 %1541 }
 0x2e2   : > { %v1543_v61 = vsub.f32 %v1538_v57, %v1542_v60  ;;  %v3439_v57 = vld [vmem:[#allocation14 + $0x10] sm:$0xff] }
 0x2e4   : > { %v1544_v62 = vmul.f32 1.442695, %v1543_v61 }
 0x2e6   : > { %3714 = vpow2.f32 %v1544_v62 }
 0x2ec   : > { %v3715_v63 = vpop.eup %3714 }
 0x2ed   : > { %v1546_v0 = vsel %vm1539_vm3, %v3715_v63, 0.0 }
 0x2ee   : > { %1547 = vadd.xlane.f32.xlu0 %v1546_v0 }
 0x302   : > { %1779 = vrot.lane.b32.xlu0 %v1514_v37, %s4322_s27 }
 0x361   : > { %v1548_v1 = vpop.xlane.xlu0 %1547 }
 0x362   : > { %3716 = vrcp.f32 %v1548_v1 }
 0x368   : > { %v3717_v2 = vpop.eup %3716 }
 0x369   : > { %v1550_v3 = vmul.f32 %v3717_v2, %v3715_v63 }
 0x36b   : > { %v1551_v5 = vpack.c.bf16 %v1550_v3, %v1550_v3 }
 0x36d   : > { %3162 = vmatmul.msk.bf16.vlgmr.msra.gmra.mxu3 %vm1539_vm3, %v1551_v5 }
 0x36e   : > { %1708 = vmatpush.bf16.xpose.msra.mxu3 %v1699_v6  ;;  %v3444_v6 = vld [vmem:[#allocation14 + $0x38] sm:$0xff] }
 0x374   : > { %v1780_v14 = vpop.permute.xlu0 %1779 }
 0x37d   : > { %3163 = vmatmul.msk.bf16.vlgmr.msrb.gmra.mxu3 %vm1517_vm0, %v1575_v7  ;;  %v3443_v7 = vld [vmem:[#allocation14 + $0x30] sm:$0xff] }
 0x38d   : > { %3183 = vmatmul.msk.bf16.vlgmr.msra.gmra.mxu3 %vm1517_vm0, %v1692_v8  ;;  %v3442_v8 = vld [vmem:[#allocation14 + $0x28] sm:$0xff] }
 0x3f0   : > { %v1568_v9 = vpop.f32.mrf.mxu3 }
 0x3f1   : > { %v1572_v10 = vpack.c.bf16 %v1568_v9, %v1568_v9  ;;  %v3441_v9 = vld [vmem:[#allocation14 + $0x20] sm:$0xff] }
 0x3f3   : > { %3182 = vmatmul.msk.bf16.vlgmr.msra.gmra.mxu2 %vm1517_vm0, %v1572_v10 }
 0x3f8   : > { %v1570_v11 = vpop.f32.mrf.mxu3 }
 0x400   : > { %v1594_v12 = vpop.f32.mrf.mxu3 }
 0x401   : > { %v1598_v13 = vmul.f32 0.17677669, %v1594_v12 }
 0x403   : > { %3194 = vmatmul.msk.bf16.vlgmr.msrb.gmra.mxu2 %vm1517_vm0, %v1780_v14  ;;  %v1599_v15 = vadd.f32 %v1598_v13, %v1252_v54 }
 0x405   : > { %v1600_v16 = vsel %vm1539_vm3, %v1599_v15, -inf }
 0x406   : > { %1601 = vmax.xlane.f32.xlu2 %v1600_v16 }
 0x408   : > { %v1596_v17 = vpop.f32.mrf.mxu3 }
 0x410   : > { %v1710_v18 = vpop.f32.mrf.mxu3 }
 0x411   : > { %v1714_v19 = vmul.f32 0.17677669, %v1710_v18 }
 0x413   : > { %v1715_v20 = vadd.f32 %v1714_v19, %v1252_v54 }
 0x415   : > { %v1716_v21 = vsel %vm1539_vm3, %v1715_v20, -inf }
 0x416   : > { %1717 = vmax.xlane.f32.xlu0 %v1716_v21 }
 0x418   : > { %v1712_v23 = vpop.f32.mrf.mxu3 }
 0x42a   : > { %1816 = vrot.lane.b32.xlu0 %v4834_v43, %s4322_s27 }
 0x476   : > { %v4857_v24 = vpop.f32.mrf.mxu2 }
 0x479   : > { %v1602_v25 = vpop.xlane.xlu2 %1601 }
 0x47a   : > { %v1603_v26 = vsub.f32 %v1599_v15, %v1602_v25  ;;  %v3701_v25 = vld [vmem:[%s5059_s2] ss:$0 sm:$0xff]  ;;  %s2771_s2 = scalar_lea.hbm %s5071_s10, %s3410_s13 }
 0x47c   : > { %v1604_v27 = vmul.f32 1.442695, %v1603_v26 }
 0x47e   : > { %3718 = vpow2.f32 %v1604_v27  ;;  %v1689_v28 = vpop.f32.mrf.mxu2 }
 0x484   : > { %v3719_v29 = vpop.eup %3718 }
 0x485   : > { %v1606_v30 = vsel %vm1539_vm3, %v3719_v29, 0.0 }
 0x486   : > { %1607 = vadd.xlane.f32.xlu2 %v1606_v30  ;;  %v1798_v31 = vpop.f32.mrf.mxu2  ;;  %v4326_v30 = vmov 128.0  }
 0x487   : > { %v1802_v32 = vmul.f32 0.17677669, %v1798_v31  ;;  %v3460_v31 = vld [vmem:[#allocation17 + $0x38] sm:$0xff] }
 0x488   : > { %2098 = vmatpush.bf16.msra.mxu2 %v3460_v31 }
 0x489   : > { %v1718_v33 = vpop.xlane.xlu0 %1717  ;;  %v1803_v34 = vadd.f32 %v1802_v32, %v1252_v54  ;;  %v3440_v54 = vld [vmem:[#allocation14 + $0x18] sm:$0xff]  ;;  %v3459_v32 = vld [vmem:[#allocation17 + $0x30] sm:$0xff] }
 0x48a   : > { %v1719_v35 = vsub.f32 %v1715_v20, %v1718_v33  ;;  %v3452_v33 = vld [vmem:[#allocation16 + $0x38] sm:$0xff] }
 0x48b   : > { %v1804_v36 = vsel %vm1539_vm3, %v1803_v34, -inf }
 0x48c   : > { %v1720_v37 = vmul.f32 1.442695, %v1719_v35  ;;  %1805 = vmax.xlane.f32.xlu1 %v1804_v36  ;;  %2099 = vmatpush.bf16.msra.mxu2 %v3459_v32  ;;  %v3458_v35 = vld [vmem:[#allocation17 + $0x28] sm:$0xff]  ;;  %v3457_v36 = vld [vmem:[#allocation17 + $0x20] sm:$0xff] }
 0x48d   : > { %v3466_v32 = vld [vmem:[#allocation19 + $0x28] sm:$0xff] }
 0x48e   : > { %3720 = vpow2.f32 %v1720_v37  ;;  %v1800_v38 = vpop.f32.mrf.mxu2 }
 0x48f   : > { %v3456_v38 = vld [vmem:[#allocation17 + $0x18] sm:$0xff] }
 0x490   : > { %2100 = vmatpush.bf16.msra.mxu2 %v3458_v35  ;;  %v3464_v35 = vld [vmem:[#allocation19 + $0x18] sm:$0xff] }
 0x494   : > { %v3721_v39 = vpop.eup %3720  ;;  %2101 = vmatpush.bf16.msra.mxu2 %v3457_v36  ;;  %v3461_v36 = vld [vmem:[#allocation19] sm:$0xff] }
 0x495   : > { %v1722_v40 = vsel %vm1539_vm3, %v3721_v39, 0.0 }
 0x496   : > { %1723 = vadd.xlane.f32.xlu1 %v1722_v40 }
 0x498   : > { %2102 = vmatpush.bf16.msra.mxu2 %v3456_v38 }
 0x49c   : > { %v1817_v41 = vpop.permute.xlu0 %1816 }
 0x49d   : > { %v1822_v42 = vsel %vm1555_vm1, %v1817_v41, 0 }
 0x49e   : > { %1613 = vrot.lane.b32.xlu2 %v4834_v43, %s4323_s20  ;;  %1831 = vmatpush.bf16.msrb.mxu3 %v1822_v42 }
 0x4f9   : > { %v1608_v44 = vpop.xlane.xlu2 %1607 }
 0x4fa   : > { %3722 = vrcp.f32 %v1608_v44 }
 0x4ff   : > { %v1806_v45 = vpop.xlane.xlu1 %1805 }
 0x500   : > { %v3723_v46 = vpop.eup %3722  ;;  %v1807_v47 = vsub.f32 %v1803_v34, %v1806_v45 }
 0x501   : > { %v1610_v48 = vmul.f32 %v3723_v46, %v3719_v29  ;;  %v1614_v49 = vpop.permute.xlu2 %1613 }
 0x502   : > { %v1808_v51 = vmul.f32 1.442695, %v1807_v47  ;;  %v1619_v52 = vsel %vm1555_vm1, %v1614_v49, 0  ;;  %v3454_v47 = vld [vmem:[#allocation17 + $0x8] sm:$0xff]  ;;  %v3453_v49 = vld [vmem:[#allocation17] sm:$0xff] }
 0x503   : > { %1628 = vmatpush.bf16.msrb.mxu1 %v1619_v52  ;;  %v1611_v53 = vpack.c.bf16 %v1610_v48, %v1610_v48  ;;  %v3451_v48 = vld [vmem:[#allocation16 + $0x30] sm:$0xff] }
 0x504   : > { %3724 = vpow2.f32 %v1808_v51  ;;  %v3450_v51 = vld [vmem:[#allocation16 + $0x28] sm:$0xff] }
 0x505   : > { %v1909_v52 = vld [vmem:[%s1084_s14] sm:$0xff]  ;;  %s5062_s14 = sld [smem:[#allocation51_spill]] }
 0x506   : > { %3164 = vmatmul.msk.bf16.vlgmr.msrb.gmra.mxu1 %vm1539_vm3, %v1611_v53  ;;  %v4884_v53 = vpack.c.bf16 %v1909_v52, %v1909_v52 }
 0x507   : > { %1656 = vmatpush.bf16.msra.mxu1 %v3440_v54  ;;  %v3449_v54 = vld [vmem:[#allocation16 + $0x20] sm:$0xff] }
 0x509   : > { %v1724_v58 = vpop.xlane.xlu1 %1723 }
 0x50a   : > { %v3725_v55 = vpop.eup %3724 }
 0x50b   : > { %v1810_v56 = vsel %vm1539_vm3, %v3725_v55, 0.0  ;;  %1657 = vmatpush.bf16.msra.mxu1 %v3439_v57  ;;  %v3446_v57 = vld [vmem:[#allocation16 + $0x8] sm:$0xff] }
 0x50c   : > { %1811 = vadd.xlane.f32.xlu1 %v1810_v56  ;;  %v3447_v56 = vld [vmem:[#allocation16 + $0x10] sm:$0xff] }
 0x50f   : > { %1771 = vmatpush.bf16.msrb.mxu1 %v3442_v8 }
 0x513   : > { %1772 = vmatpush.bf16.msrb.mxu1 %v3441_v9 }
 0x525   : > { %1728 = vrot.lane.b32.xlu1 %v4834_v43, %s4324_s7 }
 0x57f   : > { %v1812_v59 = vpop.xlane.xlu1 %1811 }
 0x580   : > { %3726 = vrcp.f32 %v1812_v59 }
 0x581   : > { %3728 = vrcp.f32 %v1724_v58  ;;  %v3445_v58 = vld [vmem:[#allocation16] sm:$0xff] }
 0x582   : > { %3730 = vrcp.f32 %v4326_v30 }
 0x583   : > { %v1630_v60 = vpop.f32.mrf.mxu1 }
 0x584   : > { %v1634_v61 = vpack.c.bf16 %v1630_v60, %v1630_v60 }
 0x586   : > { %v3727_v62 = vpop.eup %3726  ;;  %3173 = vmatmul.msk.bf16.vlgmr.msra.gmra.mxu1 %vm1517_vm0, %v1634_v61 }
 0x587   : > { %v1814_v63 = vmul.f32 %v3727_v62, %v3725_v55  ;;  %v3729_v2 = vpop.eup %3728  ;;  %2033 = vmatpush.bf16.msra.mxu1 %v3452_v33  ;;  %v3448_v55 = vld [vmem:[#allocation16 + $0x18] sm:$0xff] }
 0x588   : > { %v1726_v3 = vmul.f32 %v3729_v2, %v3721_v39  ;;  %v3731_v34 = vpop.eup %3730 }
 0x589   : > { %v1815_v0 = vpack.c.bf16 %v1814_v63, %v1814_v63  ;;  %vm1881_vm4 = vweird.f32 %v3731_v34 }
 0x58a   : > { %v1727_v5 = vpack.c.bf16 %v1726_v3, %v1726_v3 }
 0x58b   : > { %v1632_v1 = vpop.f32.mrf.mxu1  ;;  %3195 = vmatmul.msk.bf16.vlgmr.msrb.gmra.mxu3 %vm1539_vm3, %v1815_v0  ;;  %2034 = vmatpush.bf16.msra.mxu1 %v3451_v48 }
 0x58f   : > { %2035 = vmatpush.bf16.msra.mxu1 %v3450_v51  ;;  %v3469_v51 = vld [vmem:[#allocation20] sm:$0xff] }
 0x593   : > { %2036 = vmatpush.bf16.msra.mxu1 %v3449_v54 }
 0x597   : > { %v1729_v4 = vpop.permute.xlu1 %1728  ;;  %2037 = vmatpush.bf16.msra.mxu1 %v3448_v55 }
 0x598   : > { %v1734_v43 = vsel %vm1555_vm1, %v1729_v4, 0  ;;  %v3702_v4 = vld [vmem:[%s5060_s8] ss:$0 sm:$0xff]  ;;  %s1239_s8 = scalar_lea.vmem [#allocation25], %s4771_s16 }
 0x599   : > { %1743 = vmatpush.bf16.msrb.mxu0 %v1734_v43 }
 0x59b   : > { %2038 = vmatpush.bf16.msra.mxu1 %v3447_v56 }
 0x59c   : > { %3184 = vmatmul.msk.bf16.vlgmr.msrb.gmra.mxu0 %vm1539_vm3, %v1727_v5 }
 0x59d   : > { %1859 = vmatpush.bf16.msra.mxu0 %v3444_v6  ;;  %v3703_v6 = vld [vmem:[%s5061_s17] ss:$0 sm:$0xff]  ;;  %s2773_s17 = sshll.u32 %s1239_s8, 4  ;;  %s2774_s17 = int_to_ptr.vmem [resolvable:$true] %s2773_s17 }
 0x59f   : > { %2039 = vmatpush.bf16.msra.mxu1 %v3446_v57 }
 0x5a1   : > { %1860 = vmatpush.bf16.msra.mxu0 %v3443_v7 }
 0x5a3   : > { %2040 = vmatpush.bf16.msra.mxu1 %v3445_v58 }
 0x603   : > { %v1659_v10 = vpop.f32.mrf.mxu1 }
 0x604   : > { %v1688_v20 = vadd.f32 %v4857_v24, %v1659_v10  ;;  %v1877_v24 = vmul.f32 128.0, %v3731_v34  ;;  %v3704_v10 = vld [vmem:[%s5062_s14] ss:$0 sm:$0xff]  ;;  %s2775_s14 = sshll.u32 %s2771_s2, 4  ;;  %s2776_s14 = int_to_ptr.hbm [resolvable:$true] %s2775_s14 }
 0x606   : > { %v1878_v37 = vsub.f32 1.0, %v1877_v24  ;;  %v3462_v24 = vld [vmem:[#allocation19 + $0x8] sm:$0xff] }
 0x608   : > { %v1879_v39 = vmul.f32 %v3731_v34, %v1878_v37 }
 0x60a   : > { %v1880_v40 = vadd.f32 %v3731_v34, %v1879_v39 }
 0x60b   : > { %v1661_v11 = vpop.f32.mrf.mxu1 }
 0x60c   : > { %v4879_v41 = vsel %vm1881_vm4, %v3731_v34, %v1880_v40  ;;  %v3465_v34 = vld [vmem:[#allocation19 + $0x20] sm:$0xff] }
 0x60e   : > { %v1833_v12 = vpop.f32.mrf.mxu3 }
 0x60f   : > { %v1837_v13 = vpack.c.bf16 %v1833_v12, %v1833_v12 }
 0x611   : > { %3204 = vmatmul.msk.bf16.vlgmr.msra.gmra.mxu0 %vm1517_vm0, %v1837_v13 }
 0x616   : > { %v1835_v14 = vpop.f32.mrf.mxu3 }
 0x619   : > { %v1745_v15 = vpop.f32.mrf.mxu0 }
 0x61a   : > { %v1749_v16 = vpack.c.bf16 %v1745_v15, %v1745_v15 }
 0x61c   : > { %3193 = vmatmul.msk.bf16.vlgmr.msrb.gmra.mxu1 %vm1517_vm0, %v1749_v16  ;;  %v3705_v16 = vld [vmem:[%s5063_s3] ss:$0 sm:$0xff]  ;;  %s4188_s3 = sshra.s32 %s2776_s14, 4  ;;  %s4189_s3 = int_to_ptr.hbm [resolvable:$true] %s4188_s3 }
 0x61d   : > { %p4195_p0 = scmp.lt.s32.totalorder %s4189_s3, %s5071_s10 }
 0x621   : > { %v1747_v17 = vpop.f32.mrf.mxu0 }
 0x68e   : > { %v1862_v18 = vpop.f32.mrf.mxu0 }
 0x696   : > { %v1864_v19 = vpop.f32.mrf.mxu0 }
 0x699   : > { %v1774_v21 = vpop.f32.mrf.mxu1 }
 0x69a   : > { %v1778_v23 = vadd.f32 %v1774_v21, %v1688_v20  ;;  %v1910_v21 = vld [vmem:[%s1098_s6] sm:$0x1]  ;;  %s5064_s6 = sld [smem:[#allocation53_spill]] }
 0x69b   : > { %vm1911_vm8 = vcmp.ne.s32.totalorder %v1910_v21, 0 }
 0x69c   : > { %v1866_v26 = vadd.f32 %v1862_v18, %v1778_v23  ;;  %v1912_v23 = vsel %vm1911_vm8, -1e+09, %v4325_v50  ;;  %v3463_v50 = vld [vmem:[#allocation19 + $0x10] sm:$0xff] }
 0x69e   : > { %v1870_v27 = vadd.f32 %v3701_v25, %v1866_v26  ;;  %v4904_v25 = vperm.slane %v1912_v23, 0  ;;  %v3468_v26 = vld [vmem:[#allocation19 + $0x38] sm:$0xff] }
 0x69f   : > { %2162 = vmatpush.bf16.msra.mxu3 %v3468_v26 }
 0x6a0   : > { %v1873_v28 = vadd.f32 %v1870_v27, %v4820_v22  ;;  %v3455_v22 = vld [vmem:[#allocation17 + $0x10] sm:$0xff] }
 0x6a1   : > { %v1776_v29 = vpop.f32.mrf.mxu1  ;;  %2103 = vmatpush.bf16.msra.mxu2 %v3455_v22 }
 0x6a2   : > { %1874 = vadd.xlane.f32.xlu2 %v1873_v28  ;;  %v3467_v29 = vld [vmem:[#allocation19 + $0x30] sm:$0xff] }
 0x6a3   : > { %2163 = vmatpush.bf16.msra.mxu3 %v3467_v29 }
 0x6a5   : > { %2104 = vmatpush.bf16.msra.mxu2 %v3454_v47 }
 0x6a7   : > { %2164 = vmatpush.bf16.msra.mxu3 %v3466_v32 }
 0x6a9   : > { %2105 = vmatpush.bf16.msra.mxu2 %v3453_v49  ;;  %v3470_v49 = vld [vmem:[#allocation20 + $0x8] sm:$0xff] }
 0x6ab   : > { %2165 = vmatpush.bf16.msra.mxu3 %v3465_v34 }
 0x6ac   : > { %2106 = vmatmul.bf16.vlgmr.msra.gmra.mxu2 %v4884_v53 }
 0x6af   : > { %2166 = vmatpush.bf16.msra.mxu3 %v3464_v35 }
 0x6b3   : > { %2167 = vmatpush.bf16.msra.mxu3 %v3463_v50 }
 0x6b7   : > { %2168 = vmatpush.bf16.msra.mxu3 %v3462_v24 }
 0x6bb   : > { %2169 = vmatpush.bf16.msra.mxu3 %v3461_v36 }
 0x6be   : > { %2170 = vmatmul.bf16.vlgmr.msra.gmra.mxu3 %v4884_v53 }
 0x715   : > { %v1875_v42 = vpop.xlane.xlu2 %1874 }
 0x716   : > { %v1883_v44 = vmul.f32 %v4879_v41, %v1875_v42 }
 0x718   : > { %v1884_v45 = vsub.f32 %v1873_v28, %v1883_v44 }
 0x71a   : > { %v1885_v46 = vmul.f32 %v1884_v45, %v1884_v45 }
 0x71c   : > { %1886 = vadd.xlane.f32.xlu0 %v1885_v46 }
 0x72f   : > { %v2107_v11 = vpop.f32.mrf.mxu2 }
 0x730   : > { %v2108_v12 = vadd.f32 %v3704_v10, %v2107_v11 }
 0x732   : > { %v2176_v13 = vpack.c.bf16 %v2108_v12, %v2108_v12 }
 0x734   : > { %v2182_v14 = vsel %vm1517_vm0, %v2176_v13, 0 }
 0x735   : > { %2191 = vmatpush.bf16.xpose.msrb.mxu0 %v2182_v14 }
 0x737   : > { %v2109_v15 = vpop.f32.mrf.mxu2 }
 0x741   : > { %v2171_v42 = vpop.f32.mrf.mxu3 }
 0x749   : > { %v2173_v44 = vpop.f32.mrf.mxu3 }
 0x78f   : > { %v1887_v59 = vpop.xlane.xlu0 %1886 }
 0x790   : > { %v1888_v60 = vmul.f32 %v1887_v59, %v4879_v41 }
 0x792   : > { %v1889_v61 = vadd.f32 1e-06, %v1888_v60 }
 0x794   : > { %3732 = vrsqrt.f32 %v1889_v61  ;;  %vm1896_vm6 = vweird.f32 %v1889_v61 }
 0x79a   : > { %v3733_v62 = vpop.eup %3732 }
 0x79b   : > { %v1891_v63 = vmul.f32 %v3733_v62, %v1889_v61  ;;  %vm1897_vm5 = vweird.f32 %v3733_v62 }
 0x79c   : > { %vm1898_vm7 = vmor %vm1896_vm6, %vm1897_vm5 }
 0x79d   : > { %v1892_v0 = vmul.f32 %v3733_v62, %v1891_v63 }
 0x79f   : > { %v1893_v1 = vmul.f32 0.5, %v1892_v0 }
 0x7a1   : > { %v1894_v2 = vsub.f32 1.5, %v1893_v1 }
 0x7a3   : > { %v1895_v3 = vmul.f32 %v3733_v62, %v1894_v2 }
 0x7a5   : > { %v1899_v43 = vsel %vm1898_vm7, %v3733_v62, %v1895_v3 }
 0x7a6   : > { %v1900_v5 = vmul.f32 %v1899_v43, %v1884_v45  ;;  %v3706_v45 = vld [vmem:[%s5064_s6] ss:$0 sm:$0xff]  ;;  %s4190_s6 = scalar_lea.hbm %s4189_s3, 8 }
 0x7a7   : > { %v2172_v46 = vadd.f32 %v3706_v45, %v2171_v42  ;;  %p4191_p3 = scmp.ne.s32.totalorder %s4189_s3, %s4190_s6 }
 0x7a8   : > { %v1904_v7 = vmul.f32 %v3702_v4, %v1900_v5 }
 0x7a9   : > { %v4914_v47 = vpack.c.bf16 %v2172_v46, %v2172_v46  ;;  %p4192_p6 = pnand %p4191_p3, %p4711_p9 }
 0x7aa   : > { %v4890_v8 = vadd.f32 %v3703_v6, %v1904_v7 }
 0x7ab   : > { %v2218_v48 = vsel %vm1555_vm1, %v4914_v47, 0  ;;  %p4193_p8 = pneg %p4192_p6 }
 0x7ac   : > { %v1981_v9 = vpack.c.bf16 %v4890_v8, %v4890_v8  ;;  %2227 = vmatpush.bf16.msra.mxu0 %v2218_v48 }
 0x7ae   : > { %2041 = vmatmul.bf16.vlgmr.msra.gmra.mxu1 %v1981_v9 }
 0x82b   : > { %v2042_v17 = vpop.f32.mrf.mxu1 }
 0x82c   : > { %v2043_v18 = vadd.f32 %v3705_v16, %v2042_v17 }
 0x82e   : > { %v2175_v19 = vpack.c.bf16 %v2043_v18, %v2043_v18 }
 0x830   : > { %2235 = vrot.lane.b32.xlu0 %v2175_v19, %s4323_s20  ;;  %3301 = vmatmul.msk.bf16.vlgmr.msrb.gmra.mxu0 %vm1517_vm0, %v2175_v19 }
 0x831   : > { %2345 = vmatpush.bf16.msrb.mxu0 %v3470_v49 }
 0x833   : > { %v2044_v20 = vpop.f32.mrf.mxu1 }
 0x835   : > { %2346 = vmatpush.bf16.msrb.mxu0 %v3469_v51 }
 0x838   : > { %2352 = vrot.lane.b32.xlu0 %v2175_v19, %s4324_s7 }
 0x840   : > { %2440 = vrot.lane.b32.xlu0 %v2175_v19, %s4322_s27 }
 0x8a2   : > { %v2236_v60 = vpop.permute.xlu0 %2235 }
 0x8aa   : > { %v2353_v63 = vpop.permute.xlu0 %2352 }
 0x8ad   : > { %v2193_v27 = vpop.f32.mrf.mxu0 }
 0x8ae   : > { %v2197_v28 = vmul.f32 0.17677669, %v2193_v27 }
 0x8b0   : > { %v2201_v30 = vadd.f32 %v4904_v25, %v2197_v28 }
 0x8b2   : > { %v2202_v31 = vsel %vm1539_vm3, %v2201_v30, -inf  ;;  %v2441_v7 = vpop.permute.xlu0 %2440 }
 0x8b3   : > { %2203 = vmax.xlane.f32.xlu1 %v2202_v31 }
 0x8b5   : > { %v2195_v33 = vpop.f32.mrf.mxu0 }
 0x8cc   : > { %2354 = vrot.lane.b32.xlu1 %v2176_v13, %s4324_s7 }
 0x926   : > { %v2204_v37 = vpop.xlane.xlu1 %2203 }
 0x927   : > { %v2205_v38 = vsub.f32 %v2201_v30, %v2204_v37 }
 0x929   : > { %v2206_v39 = vmul.f32 1.442695, %v2205_v38 }
 0x92b   : > { %3734 = vpow2.f32 %v2206_v39 }
 0x931   : > { %v3735_v22 = vpop.eup %3734 }
 0x932   : > { %v2208_v40 = vsel %vm1539_vm3, %v3735_v22, 0.0 }
 0x933   : > { %2209 = vadd.xlane.f32.xlu2 %v2208_v40  ;;  %v3472_v40 = vld [vmem:[#allocation20 + $0x18] sm:$0xff] }
 0x934   : > { %2317 = vmatpush.bf16.msrb.mxu3 %v3472_v40 }
 0x93e   : > { %v2355_v54 = vpop.permute.xlu1 %2354 }
 0x93f   : > { %v2360_v58 = vsel %vm1517_vm0, %v2355_v54, 0  ;;  %v3473_v54 = vld [vmem:[#allocation20 + $0x20] sm:$0xff] }
 0x94b   : > { %2238 = vrot.lane.b32.xlu2 %v2176_v13, %s4323_s20 }
 0x953   : > { %2442 = vrot.lane.b32.xlu2 %v2176_v13, %s4322_s27 }
 0x9a6   : > { %v2210_v52 = vpop.xlane.xlu2 %2209 }
 0x9a7   : > { %3736 = vrcp.f32 %v2210_v52  ;;  %v3471_v52 = vld [vmem:[#allocation20 + $0x10] sm:$0xff] }
 0x9a8   : > { %2318 = vmatpush.bf16.msrb.mxu3 %v3471_v52 }
 0x9ad   : > { %v3737_v53 = vpop.eup %3736 }
 0x9ae   : > { %v2212_v55 = vmul.f32 %v3737_v53, %v3735_v22  ;;  %v2239_v56 = vpop.permute.xlu2 %2238  ;;  %v3474_v53 = vld [vmem:[#allocation20 + $0x28] sm:$0xff] }
 0x9af   : > { %v2244_v57 = vsel %vm1517_vm0, %v2239_v56, 0  ;;  %2432 = vmatpush.bf16.msra.mxu3 %v3474_v53 }
 0x9b0   : > { %v2213_v59 = vpack.c.bf16 %v2212_v55, %v2212_v55  ;;  %2253 = vmatpush.bf16.xpose.msrb.mxu1 %v2244_v57 }
 0x9b2   : > { %3302 = vmatmul.msk.bf16.vlgmr.msra.gmra.mxu0 %vm1539_vm3, %v2213_v59 }
 0x9b3   : > { %2433 = vmatpush.bf16.msra.mxu3 %v3473_v54 }
 0x9b6   : > { %v2443_v61 = vpop.permute.xlu2 %2442 }
 0x9b7   : > { %v2448_v62 = vsel %vm1517_vm0, %v2443_v61, 0  ;;  %3303 = vmatmul.msk.bf16.vlgmr.msrb.gmra.mxu1 %vm1517_vm0, %v2236_v60 }
 0x9b8   : > { %2369 = vmatpush.bf16.xpose.msra.mxu1 %v2360_v58  ;;  %2457 = vmatpush.bf16.xpose.msra.mxu0 %v2448_v62 }
 0x9c7   : > { %3323 = vmatmul.msk.bf16.vlgmr.msra.gmra.mxu1 %vm1517_vm0, %v2353_v63 }
 0xa2f   : > { %v2229_v0 = vpop.f32.mrf.mxu0 }
 0xa30   : > { %v2233_v1 = vpack.c.bf16 %v2229_v0, %v2229_v0 }
 0xa32   : > { %3322 = vmatmul.msk.bf16.vlgmr.msrb.gmra.mxu0 %vm1517_vm0, %v2233_v1 }
 0xa34   : > { %v2255_v2 = vpop.f32.mrf.mxu1 }
 0xa35   : > { %v2259_v3 = vmul.f32 0.17677669, %v2255_v2  ;;  %v3476_v2 = vld [vmem:[#allocation20 + $0x38] sm:$0xff] }
 0xa37   : > { %v2231_v4 = vpop.f32.mrf.mxu0  ;;  %v2260_v43 = vadd.f32 %v2259_v3, %v4904_v25  ;;  %v3475_v3 = vld [vmem:[#allocation20 + $0x30] sm:$0xff] }
 0xa39   : > { %v2261_v5 = vsel %vm1539_vm3, %v2260_v43, -inf }
 0xa3a   : > { %2262 = vmax.xlane.f32.xlu2 %v2261_v5 }
 0xa3c   : > { %v2257_v6 = vpop.f32.mrf.mxu1 }
 0xa42   : > { %3334 = vmatmul.msk.bf16.vlgmr.msra.gmra.mxu0 %vm1517_vm0, %v2441_v7 }
 0xa44   : > { %v2371_v9 = vpop.f32.mrf.mxu1 }
 0xa45   : > { %v2375_v10 = vmul.f32 0.17677669, %v2371_v9 }
 0xa47   : > { %v2376_v11 = vadd.f32 %v2375_v10, %v4904_v25 }
 0xa49   : > { %v2377_v12 = vsel %vm1539_vm3, %v2376_v11, -inf }
 0xa4a   : > { %2378 = vmax.xlane.f32.xlu1 %v2377_v12 }
 0xa4c   : > { %v2373_v13 = vpop.f32.mrf.mxu1 }
 0xa4d   : > { %v3707_v13 = vld [vmem:[%s5065_s29] ss:$0 sm:$0xff]  ;;  %s4194_s29 = scalar_lea.hbm %s5071_s10, 16 }
 0xa4e   : > { %p4196_p13 = scmp.lt.s32.totalorder %s4194_s29, %s4190_s6 }
 0xa50   : > { %p4197_p4 = por %p4196_p13, %p4195_p0 }
 0xa52   : > { %p4198_p2 = pnand %p4197_p4, %p4193_p8 }
 0xa63   : > { %2274 = vrot.lane.b32.xlu1 %v4914_v47, %s4323_s20  ;;  %s5068_s20 = sld [smem:[#allocation58_spill]] }
 0xaad   : > { %v2263_v14 = vpop.xlane.xlu2 %2262 }
 0xaae   : > { %v2264_v15 = vsub.f32 %v2260_v43, %v2263_v14 }
 0xaaf   : > { %v4932_v16 = vpop.f32.mrf.mxu0 }
 0xab0   : > { %v2265_v17 = vmul.f32 1.442695, %v2264_v15 }
 0xab2   : > { %3738 = vpow2.f32 %v2265_v17 }
 0xab7   : > { %v2350_v18 = vpop.f32.mrf.mxu0 }
 0xab8   : > { %v3739_v19 = vpop.eup %3738 }
 0xab9   : > { %v2267_v20 = vsel %vm1539_vm3, %v3739_v19, 0.0 }
 0xaba   : > { %2268 = vadd.xlane.f32.xlu2 %v2267_v20  ;;  %v3484_v20 = vld [vmem:[#allocation22 + $0x38] sm:$0xff] }
 0xabd   : > { %v2379_v21 = vpop.xlane.xlu1 %2378 }
 0xabe   : > { %v2380_v23 = vsub.f32 %v2376_v11, %v2379_v21 }
 0xabf   : > { %v2459_v26 = vpop.f32.mrf.mxu0 }
 0xac0   : > { %v2381_v27 = vmul.f32 1.442695, %v2380_v23  ;;  %v2463_v28 = vmul.f32 0.17677669, %v2459_v26 }
 0xac2   : > { %v2464_v29 = vadd.f32 %v2463_v28, %v4904_v25  ;;  %3740 = vpow2.f32 %v2381_v27  ;;  %v3482_v28 = vld [vmem:[#allocation22 + $0x28] sm:$0xff] }
 0xac4   : > { %v2465_v30 = vsel %vm1539_vm3, %v2464_v29, -inf }
 0xac5   : > { %2466 = vmax.xlane.f32.xlu0 %v2465_v30  ;;  %v3480_v30 = vld [vmem:[#allocation22 + $0x18] sm:$0xff] }
 0xac7   : > { %v2461_v31 = vpop.f32.mrf.mxu0 }
 0xac8   : > { %v3741_v32 = vpop.eup %3740  ;;  %v3479_v31 = vld [vmem:[#allocation22 + $0x10] sm:$0xff] }
 0xac9   : > { %v2383_v33 = vsel %vm1539_vm3, %v3741_v32, 0.0 }
 0xacd   : > { %2384 = vadd.xlane.f32.xlu0 %v2383_v33  ;;  %v3492_v33 = vld [vmem:[#allocation23 + $0x38] sm:$0xff] }
 0xace   : > { %2715 = vmatpush.bf16.msrb.mxu0 %v3492_v33 }
 0xad2   : > { %2389 = vrot.lane.b32.xlu2 %v4914_v47, %s4324_s7  ;;  %s5070_s7 = sld [smem:[#allocation61_spill]] }
 0xad5   : > { %v2275_v34 = vpop.permute.xlu1 %2274 }
 0xad6   : > { %v2280_v35 = vsel %vm1555_vm1, %v2275_v34, 0 }
 0xad7   : > { %2289 = vmatpush.bf16.msrb.mxu2 %v2280_v35 }
 0xb2d   : > { %v2269_v50 = vpop.xlane.xlu2 %2268 }
 0xb2e   : > { %3742 = vrcp.f32 %v2269_v50  ;;  %v3491_v50 = vld [vmem:[#allocation23 + $0x30] sm:$0xff] }
 0xb2f   : > { %2716 = vmatpush.bf16.msrb.mxu0 %v3491_v50 }
 0xb34   : > { %v3743_v24 = vpop.eup %3742 }
 0xb35   : > { %v2271_v25 = vmul.f32 %v3743_v24, %v3739_v19  ;;  %v2390_v36 = vpop.permute.xlu2 %2389 }
 0xb36   : > { %v2395_v37 = vsel %vm1555_vm1, %v2390_v36, 0  ;;  %v3489_v36 = vld [vmem:[#allocation23 + $0x20] sm:$0xff] }
 0xb37   : > { %v2272_v38 = vpack.c.bf16 %v2271_v25, %v2271_v25  ;;  %2404 = vmatpush.bf16.msra.mxu2 %v2395_v37  ;;  %v3490_v25 = vld [vmem:[#allocation23 + $0x28] sm:$0xff] }
 0xb38   : > { %v2467_v39 = vpop.xlane.xlu0 %2466  ;;  %2717 = vmatpush.bf16.msrb.mxu0 %v3490_v25 }
 0xb39   : > { %v2468_v22 = vsub.f32 %v2464_v29, %v2467_v39  ;;  %3304 = vmatmul.msk.bf16.vlgmr.msrb.gmra.mxu2 %vm1539_vm3, %v2272_v38  ;;  %v3481_v29 = vld [vmem:[#allocation22 + $0x20] sm:$0xff]  ;;  %v3488_v39 = vld [vmem:[#allocation23 + $0x18] sm:$0xff] }
 0xb3b   : > { %v2469_v42 = vmul.f32 1.442695, %v2468_v22  ;;  %2520 = vmatpush.bf16.msrb.mxu2 %v3476_v2 }
 0xb3c   : > { %2718 = vmatpush.bf16.msrb.mxu0 %v3489_v36 }
 0xb3d   : > { %3744 = vpow2.f32 %v2469_v42  ;;  %v3487_v42 = vld [vmem:[#allocation23 + $0x10] sm:$0xff] }
 0xb3f   : > { %2521 = vmatpush.bf16.msrb.mxu2 %v3475_v3 }
 0xb40   : > { %v2385_v44 = vpop.xlane.xlu0 %2384  ;;  %2719 = vmatpush.bf16.msrb.mxu0 %v3488_v39 }
 0xb41   : > { %3746 = vrcp.f32 %v2385_v44 }
 0xb43   : > { %v3745_v45 = vpop.eup %3744 }
 0xb44   : > { %v2471_v46 = vsel %vm1539_vm3, %v3745_v45, 0.0  ;;  %2720 = vmatpush.bf16.msrb.mxu0 %v3487_v42 }
 0xb45   : > { %2472 = vadd.xlane.f32.xlu0 %v2471_v46  ;;  %v3708_v46 = vld [vmem:[%s5066_s11] ss:$0 sm:$0xff] }
 0xb47   : > { %v3747_v48 = vpop.eup %3746 }
 0xb48   : > { %v2387_v49 = vmul.f32 %v3747_v48, %v3741_v32  ;;  %v3477_v32 = vld [vmem:[#allocation22] sm:$0xff] }
 0xb4a   : > { %v2388_v51 = vpack.c.bf16 %v2387_v49, %v2387_v49 }
 0xb4c   : > { %3324 = vmatmul.msk.bf16.vlgmr.msra.gmra.mxu2 %vm1539_vm3, %v2388_v51 }
 0xb59   : > { %2477 = vrot.lane.b32.xlu0 %v4914_v47, %s4322_s27  ;;  %s5067_s27 = sld [smem:[#allocation56_spill]] }
 0xb5f   : > { %v3709_v51 = vld [vmem:[%s5067_s27] ss:$0 sm:$0xff] }
 0xbb8   : > { %v2473_v57 = vpop.xlane.xlu0 %2472 }
 0xbb9   : > { %3748 = vrcp.f32 %v2473_v57  ;;  %v3710_v57 = vld [vmem:[%s5068_s20] ss:$0 sm:$0xff] }
 0xbbc   : > { %v2291_v55 = vpop.f32.mrf.mxu2 }
 0xbbd   : > { %v2295_v56 = vpack.c.bf16 %v2291_v55, %v2291_v55  ;;  %v3486_v55 = vld [vmem:[#allocation23 + $0x8] sm:$0xff] }
 0xbbe   : > { %2721 = vmatpush.bf16.msrb.mxu0 %v3486_v55 }
 0xbbf   : > { %3313 = vmatmul.msk.bf16.vlgmr.msrb.gmra.mxu3 %vm1517_vm0, %v2295_v56  ;;  %v3749_v59 = vpop.eup %3748  ;;  %v3485_v56 = vld [vmem:[#allocation23] sm:$0xff] }
 0xbc0   : > { %v2475_v60 = vmul.f32 %v3749_v59, %v3745_v45  ;;  %2648 = vmatpush.bf16.msrb.mxu3 %v3484_v20 }
 0xbc2   : > { %v2476_v47 = vpack.c.bf16 %v2475_v60, %v2475_v60  ;;  %2722 = vmatpush.bf16.msrb.mxu0 %v3485_v56 }
 0xbc4   : > { %v2293_v58 = vpop.f32.mrf.mxu2 }
 0xbcb   : > { %v2478_v61 = vpop.permute.xlu0 %2477 }
 0xbcc   : > { %v2483_v62 = vsel %vm1555_vm1, %v2478_v61, 0 }
 0xbcd   : > { %2492 = vmatpush.bf16.msrb.mxu1 %v2483_v62 }
 0xbcf   : > { %v2406_v63 = vpop.f32.mrf.mxu2 }
 0xbd0   : > { %v2410_v0 = vpack.c.bf16 %v2406_v63, %v2406_v63  ;;  %3335 = vmatmul.msk.bf16.vlgmr.msrb.gmra.mxu1 %vm1539_vm3, %v2476_v47  ;;  %v3711_v47 = vld [vmem:[%s5069_s12] ss:$0 sm:$0xff] }
 0xbd2   : > { %3333 = vmatmul.msk.bf16.vlgmr.msra.gmra.mxu3 %vm1517_vm0, %v2410_v0 }
 0xbd7   : > { %v2408_v1 = vpop.f32.mrf.mxu2 }
 0xc42   : > { %v2320_v4 = vpop.f32.mrf.mxu3 }
 0xc43   : > { %v2349_v7 = vadd.f32 %v4932_v16, %v2320_v4  ;;  %v3483_v16 = vld [vmem:[#allocation22 + $0x30] sm:$0xff] }
 0xc44   : > { %2649 = vmatpush.bf16.msrb.mxu3 %v3483_v16 }
 0xc48   : > { %2650 = vmatpush.bf16.msrb.mxu3 %v3482_v28 }
 0xc4a   : > { %v2322_v43 = vpop.f32.mrf.mxu3 }
 0xc4c   : > { %2651 = vmatpush.bf16.msrb.mxu3 %v3481_v29 }
 0xc4d   : > { %v2494_v5 = vpop.f32.mrf.mxu1 }
 0xc4e   : > { %v2498_v6 = vpack.c.bf16 %v2494_v5, %v2494_v5 }
 0xc50   : > { %3344 = vmatmul.msk.bf16.vlgmr.msrb.gmra.mxu2 %vm1517_vm0, %v2498_v6  ;;  %2652 = vmatpush.bf16.msrb.mxu3 %v3480_v30 }
 0xc54   : > { %2653 = vmatpush.bf16.msrb.mxu3 %v3479_v31 }
 0xc55   : > { %v2435_v9 = vpop.f32.mrf.mxu3  ;;  %v2496_v10 = vpop.f32.mrf.mxu1 }
 0xc56   : > { %v2439_v11 = vadd.f32 %v2435_v9, %v2349_v7 }
 0xc5d   : > { %v2437_v12 = vpop.f32.mrf.mxu3 }
 0xcd3   : > { %v2523_v14 = vpop.f32.mrf.mxu2 }
 0xcd4   : > { %v2527_v15 = vadd.f32 %v2523_v14, %v2439_v11 }
 0xcd6   : > { %v2531_v17 = vadd.f32 %v3707_v13, %v2527_v15 }
 0xcd8   : > { %v2534_v18 = vadd.f32 %v2531_v17, %v4890_v8  ;;  %v3478_v8 = vld [vmem:[#allocation22 + $0x8] sm:$0xff]  ;;  %v3712_v17 = vld [vmem:[%s5070_s7] ss:$0 sm:$0xff] }
 0xcd9   : > { %2654 = vmatpush.bf16.msrb.mxu3 %v3478_v8 }
 0xcda   : > { %2535 = vadd.xlane.f32.xlu1 %v2534_v18 }
 0xcdb   : > { %v2525_v19 = vpop.f32.mrf.mxu2 }
 0xcdc   : > { %v3713_v19 = vld [vmem:[%s5072_s19] ss:$0 sm:$0xff] }
 0xcdd   : > { %2655 = vmatpush.bf16.msrb.mxu3 %v3477_v32 }
 0xd4d   : > { %v2536_v21 = vpop.xlane.xlu1 %2535 }
 0xd4e   : > { %v2537_v23 = vmul.f32 %v2536_v21, %v4879_v41 }
 0xd50   : > { %v2538_v26 = vsub.f32 %v2534_v18, %v2537_v23 }
 0xd52   : > { %v2539_v27 = vmul.f32 %v2538_v26, %v2538_v26 }
 0xd54   : > { %2540 = vadd.xlane.f32.xlu2 %v2539_v27 }
 0xdc7   : > { %v2541_v34 = vpop.xlane.xlu2 %2540 }
 0xdc8   : > { %v2542_v35 = vmul.f32 %v2541_v34, %v4879_v41 }
 0xdca   : > { %v2543_v24 = vadd.f32 1e-06, %v2542_v35 }
 0xdcc   : > { %3750 = vrsqrt.f32 %v2543_v24  ;;  %vm2550_vm10 = vweird.f32 %v2543_v24 }
 0xdd2   : > { %v3751_v37 = vpop.eup %3750 }
 0xdd3   : > { %v2545_v38 = vmul.f32 %v3751_v37, %v2543_v24  ;;  %vm2551_vm9 = vweird.f32 %v3751_v37 }
 0xdd4   : > { %vm2552_vm11 = vmor %vm2550_vm10, %vm2551_vm9 }
 0xdd5   : > { %v2546_v22 = vmul.f32 %v3751_v37, %v2545_v38 }
 0xdd7   : > { %v2547_v40 = vmul.f32 0.5, %v2546_v22 }
 0xdd9   : > { %v2548_v44 = vsub.f32 1.5, %v2547_v40 }
 0xddb   : > { %v2549_v45 = vmul.f32 %v3751_v37, %v2548_v44 }
 0xddd   : > { %v2553_v48 = vsel %vm2552_vm11, %v3751_v37, %v2549_v45 }
 0xdde   : > { %v2554_v49 = vmul.f32 %v2553_v48, %v2538_v26 }
 0xde0   : > { %v2558_v52 = vmul.f32 %v3708_v46, %v2554_v49 }
 0xde2   : > { %v2562_v53 = vadd.f32 %v3709_v51, %v2558_v52 }
 0xde4   : > { %v2595_v54 = vpack.c.bf16 %v2562_v53, %v2562_v53 }
 0xde6   : > { %2656 = vmatmul.bf16.vlgmr.msrb.gmra.mxu3 %v2595_v54 }
 0xe69   : > { %v2657_v58 = vpop.f32.mrf.mxu3 }
 0xe6a   : > { %v2658_v59 = vadd.f32 %v3710_v57, %v2657_v58 }
 0xe6c   : > { %v2661_v60 = vmax.f32 %v2658_v59, 0.0 }
 0xe6e   : > { %v2662_v61 = vpack.c.bf16 %v2661_v60, %v2661_v60 }
 0xe70   : > { %2723 = vmatmul.bf16.vlgmr.msrb.gmra.mxu0 %v2662_v61 }
 0xe71   : > { %v2659_v62 = vpop.f32.mrf.mxu3 }
 0xeed   : > { %v2724_v63 = vpop.f32.mrf.mxu0 }
 0xeee   : > { %v2725_v0 = vadd.f32 %v3711_v47, %v2724_v63 }
 0xef0   : > { %v2730_v1 = vadd.f32 %v2725_v0, %v2562_v53 }
 0xef2   : > { %2731 = vadd.xlane.f32.xlu0 %v2730_v1 }
 0xef5   : > { %v2726_v2 = vpop.f32.mrf.mxu0 }
 0xf65   : > { %v2732_v3 = vpop.xlane.xlu0 %2731 }
 0xf66   : > { %v2733_v4 = vmul.f32 %v2732_v3, %v4879_v41 }
 0xf68   : > { %v2734_v43 = vsub.f32 %v2730_v1, %v2733_v4 }
 0xf6a   : > { %v2735_v5 = vmul.f32 %v2734_v43, %v2734_v43 }
 0xf6c   : > { %2736 = vadd.xlane.f32.xlu1 %v2735_v5 }
 0xfdf   : > { %v2737_v6 = vpop.xlane.xlu1 %2736 }
 0xfe0   : > { %v2738_v7 = vmul.f32 %v2737_v6, %v4879_v41 }
 0xfe2   : > { %v2739_v9 = vadd.f32 1e-06, %v2738_v7 }
 0xfe4   : > { %3752 = vrsqrt.f32 %v2739_v9  ;;  %vm2746_vm13 = vweird.f32 %v2739_v9 }
 0xfea   : > { %v3753_v10 = vpop.eup %3752 }
 0xfeb   : > { %v2741_v11 = vmul.f32 %v3753_v10, %v2739_v9  ;;  %vm2747_vm12 = vweird.f32 %v3753_v10 }
 0xfec   : > { %vm2748_vm14 = vmor %vm2746_vm13, %vm2747_vm12 }
 0xfed   : > { %v2742_v12 = vmul.f32 %v3753_v10, %v2741_v11 }
 0xfef   : > { %v2743_v13 = vmul.f32 0.5, %v2742_v12 }
 0xff1   : > { %v2744_v14 = vsub.f32 1.5, %v2743_v13 }
 0xff3   : > { %v2745_v15 = vmul.f32 %v3753_v10, %v2744_v14 }
 0xff5   : > { %v2749_v18 = vsel %vm2748_vm14, %v3753_v10, %v2745_v15 }
 0xff6   : > { %v2750_v41 = vmul.f32 %v2749_v18, %v2734_v43 }
 0xff8   : > { %v2754_v20 = vmul.f32 %v3712_v17, %v2750_v41 }
 0xffa   : > { %v2758_v21 = vadd.f32 %v3713_v19, %v2754_v20 }
 0xffc   : > { %2759 = vst [vmem:[%s1239_s8] sm:$0xff] %v2758_v21 }
 0xffd   : > { %4201 = shalt.err (!%p4198_p2)
}
 0xffe   : > { %3543 = dma.vmem_to_hbm [thread:$0]  (%p4711_p9), %s2774_s17, 128, %s2776_s14, %s2761_s1  }
 0xfff PF: > { %s2787_s4 = sand.u32 1, %s4264_s22   ;;  %p5073_p5 = scmp.ge.s32.totalorder %s4276_s0, 2 }
0x1000   : > { %s2788_s16 = scalar_lea.sflag [#allocation4], %s2787_s4 }
0x1001   : > { %p3590_p7 = pnand %p5073_p5, %p4719_p12 }
0x1003   : > { %p3591_p11 = pneg %p3590_p7 }
0x1005   : > { %4259 = dma.done.wait (%p3591_p11), %s2788_s16, 128  }
0x1006   : > { %4261 = vsyncadd (%p3591_p11), %s2788_s16, 4294967168  ;;  %p87_p10 = scmp.ge.s32.totalorder %s4687_s15, 4   ;;  %s5074_s22 = smov %s4268_s23 }
0x1007   : > { %s5075_s23 = smov %s4272_s26  ;;  %s5076_s26 = smov %s4699_s18 }
0x1008   : > { %s5077_s0 = smov %s4687_s15  ;;  %89 = sbr.rel (!%p87_p10) target bundleno = 76 (0x4c), region = 293 }
0x100d   :  { %2794 = vsyncpa [#allocation3], 1 }
0x100e   :  { %2796 = vsyncpa [#allocation3 + $0x1], 1 }
0x100f   :  { %2797 = vsyncpa [#allocation6], 1 }
0x1010   :  { %2799 = vsyncpa [#allocation6 + $0x1], 1 }
0x1011   :  { %2800 = vsyncpa [#allocation9], 1 }
0x1012   :  { %2802 = vsyncpa [#allocation9 + $0x1], 1 }
0x1013   :  { %2803 = vsyncpa [#allocation12], 1 }
0x1014   :  { %2804 = vsyncpa [#allocation15], 1 }
0x1015   :  { %2805 = vsyncpa [#allocation18], 1 }
0x1016   :  { %2806 = vsyncpa [#allocation21], 1 }
0x1017   :  { %2807 = vsyncpa [#allocation24], 1 }
0x1018   :  { %2808 = vsyncpa [#allocation4], 1 }
0x1019   :  { %2810 = vsyncpa [#allocation4 + $0x1], 1 }

</bundles_post_ra>
